<compile_context>
chip_gen: v5e
topology: v5e:2x2
jax: 0.10.0
libtpu: 0.0.40
codegen_flags: <defaults>
</compile_context>

<pallas_src>
import functools

import jax
import jax.numpy as jnp
from jax import lax
from jax.experimental import pallas as pl
from jax.experimental.pallas import tpu as pltpu


def _perceiver_attention_kernel(feat_ref, lat_ref, gm_ref, bm_ref, gl_ref,
                                bl_ref, wq_ref, wk_ref, wv_ref, wo_ref,
                                out_ref, *, heads, scale, eps):
    f32 = jnp.float32
    x = feat_ref[0].astype(f32)          # (F, D) media tokens
    l = lat_ref[0].astype(f32)           # (Q, D) latents

    def layer_norm(t, g, b):
        mu = jnp.mean(t, axis=-1, keepdims=True)
        c = t - mu
        var = jnp.mean(c * c, axis=-1, keepdims=True)
        return c * lax.rsqrt(var + eps) * g + b

    xn = layer_norm(x, gm_ref[...].astype(f32), bm_ref[...].astype(f32))
    ln = layer_norm(l, gl_ref[...].astype(f32), bl_ref[...].astype(f32))

    def dot_tt(a, b):   # (m, d) x (n, d) -> (m, n); contract last dims (no .T)
        return lax.dot_general(a, b, (((1,), (1,)), ((), ())),
                               preferred_element_type=f32)

    n_q = lat_ref.shape[1]
    dim = lat_ref.shape[2]
    acc = jnp.zeros((n_q, dim), f32)

    # Static (unrolled) head loop; per-head weights indexed on leading axis.
    for h in range(heads):
        wq = wq_ref[h].astype(f32)       # (D, dh)
        wk = wk_ref[h].astype(f32)       # (D, dh)
        wv = wv_ref[h].astype(f32)       # (D, dh)
        wo = wo_ref[h].astype(f32)       # (dh, D)

        qh = jnp.dot(ln, wq, preferred_element_type=f32) * scale   # (Q, dh)
        kx = jnp.dot(xn, wk, preferred_element_type=f32)           # (F, dh)
        kl = jnp.dot(ln, wk, preferred_element_type=f32)           # (Q, dh)
        vx = jnp.dot(xn, wv, preferred_element_type=f32)           # (F, dh)
        vl = jnp.dot(ln, wv, preferred_element_type=f32)           # (Q, dh)

        # Softmax over the concatenated [features; latents] axis, computed as
        # two blocks sharing one max / denominator.
        sx = dot_tt(qh, kx)                                        # (Q, F)
        sl = dot_tt(qh, kl)                                        # (Q, Q)
        m = jnp.maximum(jnp.max(sx, axis=-1, keepdims=True),
                        jnp.max(sl, axis=-1, keepdims=True))
        px = jnp.exp(sx - m)
        pq = jnp.exp(sl - m)
        denom = (jnp.sum(px, axis=-1, keepdims=True)
                 + jnp.sum(pq, axis=-1, keepdims=True))
        oh = (jnp.dot(px, vx, preferred_element_type=f32)
              + jnp.dot(pq, vl, preferred_element_type=f32)) / denom  # (Q, dh)

        # concat_h(out_h) @ Wo  ==  sum_h out_h @ Wo[h]
        acc = acc + jnp.dot(oh, wo, preferred_element_type=f32)       # (Q, D)

    out_ref[0] = acc.astype(out_ref.dtype)


def perceiver_attention_layer(features, latents, gamma_m, beta_m, gamma_l,
                              beta_l, wq, wk, wv, wo, *, heads, dim_head,
                              eps=1e-5):
    """Pallas-fused PerceiverAttentionLayer forward.

    features: (B, F, D)    latents: (B, Q, D)
    wq, wk, wv: (D, heads*dim_head)   wo: (heads*dim_head, D)
    gamma_*/beta_*: (D,) LayerNorm affine params.
    Returns (B, Q, D) in the input dtype.
    """
    B, F, D = features.shape
    Bq, Q, Dl = latents.shape
    assert B == Bq and D == Dl
    inner = heads * dim_head
    assert wq.shape == (D, inner) and wk.shape == (D, inner)
    assert wv.shape == (D, inner) and wo.shape == (inner, D)

    # Per-head weight layout: avoids any in-kernel lane slicing / head reshape.
    wq_h = wq.reshape(D, heads, dim_head).transpose(1, 0, 2)   # (H, D, dh)
    wk_h = wk.reshape(D, heads, dim_head).transpose(1, 0, 2)   # (H, D, dh)
    wv_h = wv.reshape(D, heads, dim_head).transpose(1, 0, 2)   # (H, D, dh)
    wo_h = wo.reshape(heads, dim_head, D)                      # (H, dh, D)
    gm = gamma_m.reshape(1, D)
    bm = beta_m.reshape(1, D)
    gl = gamma_l.reshape(1, D)
    bl = beta_l.reshape(1, D)

    kernel = functools.partial(_perceiver_attention_kernel, heads=heads,
                               scale=float(dim_head) ** -0.5, eps=eps)

    def batch_spec(shape):
        return pl.BlockSpec(shape, lambda b: (b, 0, 0))

    def const3(shape):
        return pl.BlockSpec(shape, lambda b: (0, 0, 0))

    def const2(shape):
        return pl.BlockSpec(shape, lambda b: (0, 0))

    return pl.pallas_call(
        kernel,
        out_shape=jax.ShapeDtypeStruct((B, Q, D), features.dtype),
        grid=(B,),
        in_specs=[
            batch_spec((1, F, D)),                 # features
            batch_spec((1, Q, D)),                 # latents
            const2((1, D)), const2((1, D)),        # media LN gamma/beta
            const2((1, D)), const2((1, D)),        # latent LN gamma/beta
            const3((heads, D, dim_head)),          # Wq per head
            const3((heads, D, dim_head)),          # Wk per head
            const3((heads, D, dim_head)),          # Wv per head
            const3((heads, dim_head, D)),          # Wo per head
        ],
        out_specs=batch_spec((1, Q, D)),
        compiler_params=pltpu.CompilerParams(
            dimension_semantics=("parallel",),     # shard batch across v7x TCs
            vmem_limit_bytes=32 * 1024 * 1024,     # headroom beyond v5e default
        ),
    )(features, latents, gm, bm, gl, bl, wq_h, wk_h, wv_h, wo_h)


def perceiver_attention_ref(features, latents, gamma_m, beta_m, gamma_l,
                            beta_l, wq, wk, wv, wo, *, heads, dim_head,
                            eps=1e-5):
    """Pure-JAX reference matching the PyTorch module."""
    hp = lax.Precision.HIGHEST

    def layer_norm(t, g, b):
        mu = jnp.mean(t, axis=-1, keepdims=True)
        var = jnp.mean(jnp.square(t - mu), axis=-1, keepdims=True)
        return (t - mu) / jnp.sqrt(var + eps) * g + b

    x = layer_norm(features, gamma_m, beta_m)
    l = layer_norm(latents, gamma_l, beta_l)
    q = jnp.einsum('bqd,de->bqe', l, wq, precision=hp)
    kv = jnp.concatenate([x, l], axis=1)
    k = jnp.einsum('bfd,de->bfe', kv, wk, precision=hp)
    v = jnp.einsum('bfd,de->bfe', kv, wv, precision=hp)

    B, Qn, _ = latents.shape

    def split(t):  # 'b n (h d) -> b h n d'
        return t.reshape(t.shape[0], t.shape[1], heads, dim_head).transpose(
            0, 2, 1, 3)

    qh, kh, vh = split(q), split(k), split(v)
    qh = qh * (dim_head ** -0.5)
    sim = jnp.einsum('bhqd,bhfd->bhqf', qh, kh, precision=hp)
    sim = sim - jnp.max(sim, axis=-1, keepdims=True)
    alphas = jax.nn.softmax(sim, axis=-1)
    out = jnp.einsum('bhqf,bhfd->bhqd', alphas, vh, precision=hp)
    out = out.transpose(0, 2, 1, 3).reshape(B, Qn, heads * dim_head)
    return jnp.einsum('bqe,ed->bqd', out, wo, precision=hp)


if __name__ == "__main__":
    B, n_features, n_latents = 2, 16, 8
    dim, heads, dim_head = 64, 4, 32
    inner = heads * dim_head

    key = jax.random.PRNGKey(0)
    ks = jax.random.split(key, 10)
    features = jax.random.normal(ks[0], (B, n_features, dim), jnp.float32)
    latents = jax.random.normal(ks[1], (B, n_latents, dim), jnp.float32)
    gamma_m = 1.0 + 0.1 * jax.random.normal(ks[2], (dim,), jnp.float32)
    beta_m = 0.1 * jax.random.normal(ks[3], (dim,), jnp.float32)
    gamma_l = 1.0 + 0.1 * jax.random.normal(ks[4], (dim,), jnp.float32)
    beta_l = 0.1 * jax.random.normal(ks[5], (dim,), jnp.float32)
    wq = jax.random.normal(ks[6], (dim, inner), jnp.float32) / jnp.sqrt(dim)
    wk = jax.random.normal(ks[7], (dim, inner), jnp.float32) / jnp.sqrt(dim)
    wv = jax.random.normal(ks[8], (dim, inner), jnp.float32) / jnp.sqrt(dim)
    wo = jax.random.normal(ks[9], (inner, dim), jnp.float32) / jnp.sqrt(inner)

    out = perceiver_attention_layer(features, latents, gamma_m, beta_m,
                                    gamma_l, beta_l, wq, wk, wv, wo,
                                    heads=heads, dim_head=dim_head)
    out = jax.block_until_ready(out)

    ref = perceiver_attention_ref(features, latents, gamma_m, beta_m,
                                  gamma_l, beta_l, wq, wk, wv, wo,
                                  heads=heads, dim_head=dim_head)

    assert out.shape == (B, n_latents, dim)
    assert out.dtype == features.dtype
    max_err = float(jnp.max(jnp.abs(out - ref)))
    assert jnp.allclose(out, ref, atol=2e-3, rtol=2e-3), max_err
    print("KERNEL_OK")
</pallas_src>

<mosaic_0001>
module attributes {stable_mosaic.version = 11 : i64} {
  func.func @_perceiver_attention_kernel(%arg0: i32, %arg1: memref<1x16x64xf32, #tpu.memory_space<vmem>>, %arg2: memref<1x8x64xf32, #tpu.memory_space<vmem>>, %arg3: memref<1x64xf32, #tpu.memory_space<vmem>>, %arg4: memref<1x64xf32, #tpu.memory_space<vmem>>, %arg5: memref<1x64xf32, #tpu.memory_space<vmem>>, %arg6: memref<1x64xf32, #tpu.memory_space<vmem>>, %arg7: memref<4x64x32xf32, #tpu.memory_space<vmem>>, %arg8: memref<4x64x32xf32, #tpu.memory_space<vmem>>, %arg9: memref<4x64x32xf32, #tpu.memory_space<vmem>>, %arg10: memref<4x32x64xf32, #tpu.memory_space<vmem>>, %arg11: memref<1x8x64xf32, #tpu.memory_space<vmem>>) attributes {dimension_semantics = [#tpu.dimension_semantics<parallel>], iteration_bounds = array<i64: 2>, scalar_prefetch = 0 : i64, scratch_operands = 0 : i64, tpu.core_type = #tpu.core_type<tc>, window_params = [{transform_indices = @transform_0, window_bounds = array<i64: 1, 16, 64>}, {transform_indices = @transform_1, window_bounds = array<i64: 1, 8, 64>}, {pipeline_mode = #tpu.pipeline_mode<synchronous>, transform_indices = @transform_2, window_bounds = array<i64: 1, 64>}, {pipeline_mode = #tpu.pipeline_mode<synchronous>, transform_indices = @transform_3, window_bounds = array<i64: 1, 64>}, {pipeline_mode = #tpu.pipeline_mode<synchronous>, transform_indices = @transform_4, window_bounds = array<i64: 1, 64>}, {pipeline_mode = #tpu.pipeline_mode<synchronous>, transform_indices = @transform_5, window_bounds = array<i64: 1, 64>}, {pipeline_mode = #tpu.pipeline_mode<synchronous>, transform_indices = @transform_6, window_bounds = array<i64: 4, 64, 32>}, {pipeline_mode = #tpu.pipeline_mode<synchronous>, transform_indices = @transform_7, window_bounds = array<i64: 4, 64, 32>}, {pipeline_mode = #tpu.pipeline_mode<synchronous>, transform_indices = @transform_8, window_bounds = array<i64: 4, 64, 32>}, {pipeline_mode = #tpu.pipeline_mode<synchronous>, transform_indices = @transform_9, window_bounds = array<i64: 4, 32, 64>}, {transform_indices = @transform_10, window_bounds = array<i64: 1, 8, 64>}]} {
    %c0 = arith.constant 0 : index
    %c0_0 = arith.constant 0 : index
    %c0_1 = arith.constant 0 : index
    %0 = vector.load %arg1[%c0, %c0_0, %c0_1] : memref<1x16x64xf32, #tpu.memory_space<vmem>>, vector<1x16x64xf32>
    %1 = vector.shape_cast %0 : vector<1x16x64xf32> to vector<16x64xf32>
    %c0_2 = arith.constant 0 : index
    %c0_3 = arith.constant 0 : index
    %c0_4 = arith.constant 0 : index
    %2 = vector.load %arg2[%c0_2, %c0_3, %c0_4] : memref<1x8x64xf32, #tpu.memory_space<vmem>>, vector<1x8x64xf32>
    %3 = vector.shape_cast %2 : vector<1x8x64xf32> to vector<8x64xf32>
    %c0_5 = arith.constant 0 : index
    %c0_6 = arith.constant 0 : index
    %4 = vector.load %arg3[%c0_5, %c0_6] : memref<1x64xf32, #tpu.memory_space<vmem>>, vector<1x64xf32>
    %c0_7 = arith.constant 0 : index
    %c0_8 = arith.constant 0 : index
    %5 = vector.load %arg4[%c0_7, %c0_8] : memref<1x64xf32, #tpu.memory_space<vmem>>, vector<1x64xf32>
    %cst = arith.constant dense<0.000000e+00> : vector<16xf32>
    %6 = vector.multi_reduction <add>, %1, %cst [1] : vector<16x64xf32> to vector<16xf32>
    %7 = vector.shape_cast %6 : vector<16xf32> to vector<16x1xf32>
    %cst_9 = arith.constant 6.400000e+01 : f32
    %8 = vector.broadcast %cst_9 : f32 to vector<16x1xf32>
    %9 = arith.divf %7, %8 : vector<16x1xf32>
    %10 = vector.broadcast %9 : vector<16x1xf32> to vector<16x64xf32>
    %11 = arith.subf %1, %10 : vector<16x64xf32>
    %12 = arith.mulf %11, %11 : vector<16x64xf32>
    %cst_10 = arith.constant dense<0.000000e+00> : vector<16xf32>
    %13 = vector.multi_reduction <add>, %12, %cst_10 [1] : vector<16x64xf32> to vector<16xf32>
    %14 = vector.shape_cast %13 : vector<16xf32> to vector<16x1xf32>
    %cst_11 = arith.constant 6.400000e+01 : f32
    %15 = vector.broadcast %cst_11 : f32 to vector<16x1xf32>
    %16 = arith.divf %14, %15 : vector<16x1xf32>
    %cst_12 = arith.constant 9.99999974E-6 : f32
    %17 = vector.broadcast %cst_12 : f32 to vector<16x1xf32>
    %18 = arith.addf %16, %17 : vector<16x1xf32>
    %19 = math.rsqrt %18 : vector<16x1xf32>
    %20 = vector.broadcast %19 : vector<16x1xf32> to vector<16x64xf32>
    %21 = arith.mulf %11, %20 : vector<16x64xf32>
    %22 = vector.broadcast %4 : vector<1x64xf32> to vector<16x64xf32>
    %23 = arith.mulf %21, %22 : vector<16x64xf32>
    %24 = vector.broadcast %5 : vector<1x64xf32> to vector<16x64xf32>
    %25 = arith.addf %23, %24 : vector<16x64xf32>
    %c0_13 = arith.constant 0 : index
    %c0_14 = arith.constant 0 : index
    %26 = vector.load %arg5[%c0_13, %c0_14] : memref<1x64xf32, #tpu.memory_space<vmem>>, vector<1x64xf32>
    %c0_15 = arith.constant 0 : index
    %c0_16 = arith.constant 0 : index
    %27 = vector.load %arg6[%c0_15, %c0_16] : memref<1x64xf32, #tpu.memory_space<vmem>>, vector<1x64xf32>
    %cst_17 = arith.constant dense<0.000000e+00> : vector<8xf32>
    %28 = vector.multi_reduction <add>, %3, %cst_17 [1] : vector<8x64xf32> to vector<8xf32>
    %29 = vector.shape_cast %28 : vector<8xf32> to vector<8x1xf32>
    %cst_18 = arith.constant 6.400000e+01 : f32
    %30 = vector.broadcast %cst_18 : f32 to vector<8x1xf32>
    %31 = arith.divf %29, %30 : vector<8x1xf32>
    %32 = vector.broadcast %31 : vector<8x1xf32> to vector<8x64xf32>
    %33 = arith.subf %3, %32 : vector<8x64xf32>
    %34 = arith.mulf %33, %33 : vector<8x64xf32>
    %cst_19 = arith.constant dense<0.000000e+00> : vector<8xf32>
    %35 = vector.multi_reduction <add>, %34, %cst_19 [1] : vector<8x64xf32> to vector<8xf32>
    %36 = vector.shape_cast %35 : vector<8xf32> to vector<8x1xf32>
    %cst_20 = arith.constant 6.400000e+01 : f32
    %37 = vector.broadcast %cst_20 : f32 to vector<8x1xf32>
    %38 = arith.divf %36, %37 : vector<8x1xf32>
    %cst_21 = arith.constant 9.99999974E-6 : f32
    %39 = vector.broadcast %cst_21 : f32 to vector<8x1xf32>
    %40 = arith.addf %38, %39 : vector<8x1xf32>
    %41 = math.rsqrt %40 : vector<8x1xf32>
    %42 = vector.broadcast %41 : vector<8x1xf32> to vector<8x64xf32>
    %43 = arith.mulf %33, %42 : vector<8x64xf32>
    %44 = vector.broadcast %26 : vector<1x64xf32> to vector<8x64xf32>
    %45 = arith.mulf %43, %44 : vector<8x64xf32>
    %46 = vector.broadcast %27 : vector<1x64xf32> to vector<8x64xf32>
    %47 = arith.addf %45, %46 : vector<8x64xf32>
    %cst_22 = arith.constant 0.000000e+00 : f32
    %48 = vector.broadcast %cst_22 : f32 to vector<8x64xf32>
    %c0_23 = arith.constant 0 : index
    %c0_24 = arith.constant 0 : index
    %c0_25 = arith.constant 0 : index
    %49 = vector.load %arg7[%c0_23, %c0_24, %c0_25] : memref<4x64x32xf32, #tpu.memory_space<vmem>>, vector<1x64x32xf32>
    %50 = vector.shape_cast %49 : vector<1x64x32xf32> to vector<64x32xf32>
    %c0_26 = arith.constant 0 : index
    %c0_27 = arith.constant 0 : index
    %c0_28 = arith.constant 0 : index
    %51 = vector.load %arg8[%c0_26, %c0_27, %c0_28] : memref<4x64x32xf32, #tpu.memory_space<vmem>>, vector<1x64x32xf32>
    %52 = vector.shape_cast %51 : vector<1x64x32xf32> to vector<64x32xf32>
    %c0_29 = arith.constant 0 : index
    %c0_30 = arith.constant 0 : index
    %c0_31 = arith.constant 0 : index
    %53 = vector.load %arg9[%c0_29, %c0_30, %c0_31] : memref<4x64x32xf32, #tpu.memory_space<vmem>>, vector<1x64x32xf32>
    %54 = vector.shape_cast %53 : vector<1x64x32xf32> to vector<64x32xf32>
    %c0_32 = arith.constant 0 : index
    %c0_33 = arith.constant 0 : index
    %c0_34 = arith.constant 0 : index
    %55 = vector.load %arg10[%c0_32, %c0_33, %c0_34] : memref<4x32x64xf32, #tpu.memory_space<vmem>>, vector<1x32x64xf32>
    %56 = vector.shape_cast %55 : vector<1x32x64xf32> to vector<32x64xf32>
    %cst_35 = arith.constant dense<0.000000e+00> : vector<8x32xf32>
    %57 = tpu.matmul %47, %50, %cst_35 {dimension_numbers = #tpu.dot_dimension_numbers<[1], [0], [0], [1], [0, 0, 1, 1], [], []>} : vector<8x64xf32>, vector<64x32xf32>, vector<8x32xf32> -> vector<8x32xf32>
    %cst_36 = arith.constant 0.176776692 : f32
    %58 = vector.broadcast %cst_36 : f32 to vector<8x32xf32>
    %59 = arith.mulf %57, %58 : vector<8x32xf32>
    %cst_37 = arith.constant dense<0.000000e+00> : vector<16x32xf32>
    %60 = tpu.matmul %25, %52, %cst_37 {dimension_numbers = #tpu.dot_dimension_numbers<[1], [0], [0], [1], [0, 0, 1, 1], [], []>} : vector<16x64xf32>, vector<64x32xf32>, vector<16x32xf32> -> vector<16x32xf32>
    %cst_38 = arith.constant dense<0.000000e+00> : vector<8x32xf32>
    %61 = tpu.matmul %47, %52, %cst_38 {dimension_numbers = #tpu.dot_dimension_numbers<[1], [0], [0], [1], [0, 0, 1, 1], [], []>} : vector<8x64xf32>, vector<64x32xf32>, vector<8x32xf32> -> vector<8x32xf32>
    %cst_39 = arith.constant dense<0.000000e+00> : vector<16x32xf32>
    %62 = tpu.matmul %25, %54, %cst_39 {dimension_numbers = #tpu.dot_dimension_numbers<[1], [0], [0], [1], [0, 0, 1, 1], [], []>} : vector<16x64xf32>, vector<64x32xf32>, vector<16x32xf32> -> vector<16x32xf32>
    %cst_40 = arith.constant dense<0.000000e+00> : vector<8x32xf32>
    %63 = tpu.matmul %47, %54, %cst_40 {dimension_numbers = #tpu.dot_dimension_numbers<[1], [0], [0], [1], [0, 0, 1, 1], [], []>} : vector<8x64xf32>, vector<64x32xf32>, vector<8x32xf32> -> vector<8x32xf32>
    %cst_41 = arith.constant dense<0.000000e+00> : vector<8x16xf32>
    %64 = tpu.matmul %59, %60, %cst_41 {dimension_numbers = #tpu.dot_dimension_numbers<[1], [1], [0], [0], [0, 0, 1, 0], [], []>} : vector<8x32xf32>, vector<16x32xf32>, vector<8x16xf32> -> vector<8x16xf32>
    %cst_42 = arith.constant dense<0.000000e+00> : vector<8x8xf32>
    %65 = tpu.matmul %59, %61, %cst_42 {dimension_numbers = #tpu.dot_dimension_numbers<[1], [1], [0], [0], [0, 0, 1, 0], [], []>} : vector<8x32xf32>, vector<8x32xf32>, vector<8x8xf32> -> vector<8x8xf32>
    %cst_43 = arith.constant dense<0xFF800000> : vector<8xf32>
    %66 = vector.multi_reduction <maximumf>, %64, %cst_43 [1] : vector<8x16xf32> to vector<8xf32>
    %67 = vector.shape_cast %66 : vector<8xf32> to vector<8x1xf32>
    %cst_44 = arith.constant dense<0xFF800000> : vector<8xf32>
    %68 = vector.multi_reduction <maximumf>, %65, %cst_44 [1] : vector<8x8xf32> to vector<8xf32>
    %69 = vector.shape_cast %68 : vector<8xf32> to vector<8x1xf32>
    %70 = arith.maximumf %67, %69 : vector<8x1xf32>
    %71 = vector.broadcast %70 : vector<8x1xf32> to vector<8x16xf32>
    %72 = arith.subf %64, %71 : vector<8x16xf32>
    %73 = math.exp %72 : vector<8x16xf32>
    %74 = vector.broadcast %70 : vector<8x1xf32> to vector<8x8xf32>
    %75 = arith.subf %65, %74 : vector<8x8xf32>
    %76 = math.exp %75 : vector<8x8xf32>
    %cst_45 = arith.constant dense<0.000000e+00> : vector<8xf32>
    %77 = vector.multi_reduction <add>, %73, %cst_45 [1] : vector<8x16xf32> to vector<8xf32>
    %78 = vector.shape_cast %77 : vector<8xf32> to vector<8x1xf32>
    %cst_46 = arith.constant dense<0.000000e+00> : vector<8xf32>
    %79 = vector.multi_reduction <add>, %76, %cst_46 [1] : vector<8x8xf32> to vector<8xf32>
    %80 = vector.shape_cast %79 : vector<8xf32> to vector<8x1xf32>
    %81 = arith.addf %78, %80 : vector<8x1xf32>
    %cst_47 = arith.constant dense<0.000000e+00> : vector<8x32xf32>
    %82 = tpu.matmul %73, %62, %cst_47 {dimension_numbers = #tpu.dot_dimension_numbers<[1], [0], [0], [1], [0, 0, 1, 1], [], []>} : vector<8x16xf32>, vector<16x32xf32>, vector<8x32xf32> -> vector<8x32xf32>
    %cst_48 = arith.constant dense<0.000000e+00> : vector<8x32xf32>
    %83 = tpu.matmul %76, %63, %cst_48 {dimension_numbers = #tpu.dot_dimension_numbers<[1], [0], [0], [1], [0, 0, 1, 1], [], []>} : vector<8x8xf32>, vector<8x32xf32>, vector<8x32xf32> -> vector<8x32xf32>
    %84 = arith.addf %82, %83 : vector<8x32xf32>
    %85 = vector.broadcast %81 : vector<8x1xf32> to vector<8x32xf32>
    %86 = arith.divf %84, %85 : vector<8x32xf32>
    %cst_49 = arith.constant dense<0.000000e+00> : vector<8x64xf32>
    %87 = tpu.matmul %86, %56, %cst_49 {dimension_numbers = #tpu.dot_dimension_numbers<[1], [0], [0], [1], [0, 0, 1, 1], [], []>} : vector<8x32xf32>, vector<32x64xf32>, vector<8x64xf32> -> vector<8x64xf32>
    %88 = arith.addf %48, %87 : vector<8x64xf32>
    %c1 = arith.constant 1 : index
    %c0_50 = arith.constant 0 : index
    %c0_51 = arith.constant 0 : index
    %89 = vector.load %arg7[%c1, %c0_50, %c0_51] : memref<4x64x32xf32, #tpu.memory_space<vmem>>, vector<1x64x32xf32>
    %90 = vector.shape_cast %89 : vector<1x64x32xf32> to vector<64x32xf32>
    %c1_52 = arith.constant 1 : index
    %c0_53 = arith.constant 0 : index
    %c0_54 = arith.constant 0 : index
    %91 = vector.load %arg8[%c1_52, %c0_53, %c0_54] : memref<4x64x32xf32, #tpu.memory_space<vmem>>, vector<1x64x32xf32>
    %92 = vector.shape_cast %91 : vector<1x64x32xf32> to vector<64x32xf32>
    %c1_55 = arith.constant 1 : index
    %c0_56 = arith.constant 0 : index
    %c0_57 = arith.constant 0 : index
    %93 = vector.load %arg9[%c1_55, %c0_56, %c0_57] : memref<4x64x32xf32, #tpu.memory_space<vmem>>, vector<1x64x32xf32>
    %94 = vector.shape_cast %93 : vector<1x64x32xf32> to vector<64x32xf32>
    %c1_58 = arith.constant 1 : index
    %c0_59 = arith.constant 0 : index
    %c0_60 = arith.constant 0 : index
    %95 = vector.load %arg10[%c1_58, %c0_59, %c0_60] : memref<4x32x64xf32, #tpu.memory_space<vmem>>, vector<1x32x64xf32>
    %96 = vector.shape_cast %95 : vector<1x32x64xf32> to vector<32x64xf32>
    %cst_61 = arith.constant dense<0.000000e+00> : vector<8x32xf32>
    %97 = tpu.matmul %47, %90, %cst_61 {dimension_numbers = #tpu.dot_dimension_numbers<[1], [0], [0], [1], [0, 0, 1, 1], [], []>} : vector<8x64xf32>, vector<64x32xf32>, vector<8x32xf32> -> vector<8x32xf32>
    %cst_62 = arith.constant 0.176776692 : f32
    %98 = vector.broadcast %cst_62 : f32 to vector<8x32xf32>
    %99 = arith.mulf %97, %98 : vector<8x32xf32>
    %cst_63 = arith.constant dense<0.000000e+00> : vector<16x32xf32>
    %100 = tpu.matmul %25, %92, %cst_63 {dimension_numbers = #tpu.dot_dimension_numbers<[1], [0], [0], [1], [0, 0, 1, 1], [], []>} : vector<16x64xf32>, vector<64x32xf32>, vector<16x32xf32> -> vector<16x32xf32>
    %cst_64 = arith.constant dense<0.000000e+00> : vector<8x32xf32>
    %101 = tpu.matmul %47, %92, %cst_64 {dimension_numbers = #tpu.dot_dimension_numbers<[1], [0], [0], [1], [0, 0, 1, 1], [], []>} : vector<8x64xf32>, vector<64x32xf32>, vector<8x32xf32> -> vector<8x32xf32>
    %cst_65 = arith.constant dense<0.000000e+00> : vector<16x32xf32>
    %102 = tpu.matmul %25, %94, %cst_65 {dimension_numbers = #tpu.dot_dimension_numbers<[1], [0], [0], [1], [0, 0, 1, 1], [], []>} : vector<16x64xf32>, vector<64x32xf32>, vector<16x32xf32> -> vector<16x32xf32>
    %cst_66 = arith.constant dense<0.000000e+00> : vector<8x32xf32>
    %103 = tpu.matmul %47, %94, %cst_66 {dimension_numbers = #tpu.dot_dimension_numbers<[1], [0], [0], [1], [0, 0, 1, 1], [], []>} : vector<8x64xf32>, vector<64x32xf32>, vector<8x32xf32> -> vector<8x32xf32>
    %cst_67 = arith.constant dense<0.000000e+00> : vector<8x16xf32>
    %104 = tpu.matmul %99, %100, %cst_67 {dimension_numbers = #tpu.dot_dimension_numbers<[1], [1], [0], [0], [0, 0, 1, 0], [], []>} : vector<8x32xf32>, vector<16x32xf32>, vector<8x16xf32> -> vector<8x16xf32>
    %cst_68 = arith.constant dense<0.000000e+00> : vector<8x8xf32>
    %105 = tpu.matmul %99, %101, %cst_68 {dimension_numbers = #tpu.dot_dimension_numbers<[1], [1], [0], [0], [0, 0, 1, 0], [], []>} : vector<8x32xf32>, vector<8x32xf32>, vector<8x8xf32> -> vector<8x8xf32>
    %cst_69 = arith.constant dense<0xFF800000> : vector<8xf32>
    %106 = vector.multi_reduction <maximumf>, %104, %cst_69 [1] : vector<8x16xf32> to vector<8xf32>
    %107 = vector.shape_cast %106 : vector<8xf32> to vector<8x1xf32>
    %cst_70 = arith.constant dense<0xFF800000> : vector<8xf32>
    %108 = vector.multi_reduction <maximumf>, %105, %cst_70 [1] : vector<8x8xf32> to vector<8xf32>
    %109 = vector.shape_cast %108 : vector<8xf32> to vector<8x1xf32>
    %110 = arith.maximumf %107, %109 : vector<8x1xf32>
    %111 = vector.broadcast %110 : vector<8x1xf32> to vector<8x16xf32>
    %112 = arith.subf %104, %111 : vector<8x16xf32>
    %113 = math.exp %112 : vector<8x16xf32>
    %114 = vector.broadcast %110 : vector<8x1xf32> to vector<8x8xf32>
    %115 = arith.subf %105, %114 : vector<8x8xf32>
    %116 = math.exp %115 : vector<8x8xf32>
    %cst_71 = arith.constant dense<0.000000e+00> : vector<8xf32>
    %117 = vector.multi_reduction <add>, %113, %cst_71 [1] : vector<8x16xf32> to vector<8xf32>
    %118 = vector.shape_cast %117 : vector<8xf32> to vector<8x1xf32>
    %cst_72 = arith.constant dense<0.000000e+00> : vector<8xf32>
    %119 = vector.multi_reduction <add>, %116, %cst_72 [1] : vector<8x8xf32> to vector<8xf32>
    %120 = vector.shape_cast %119 : vector<8xf32> to vector<8x1xf32>
    %121 = arith.addf %118, %120 : vector<8x1xf32>
    %cst_73 = arith.constant dense<0.000000e+00> : vector<8x32xf32>
    %122 = tpu.matmul %113, %102, %cst_73 {dimension_numbers = #tpu.dot_dimension_numbers<[1], [0], [0], [1], [0, 0, 1, 1], [], []>} : vector<8x16xf32>, vector<16x32xf32>, vector<8x32xf32> -> vector<8x32xf32>
    %cst_74 = arith.constant dense<0.000000e+00> : vector<8x32xf32>
    %123 = tpu.matmul %116, %103, %cst_74 {dimension_numbers = #tpu.dot_dimension_numbers<[1], [0], [0], [1], [0, 0, 1, 1], [], []>} : vector<8x8xf32>, vector<8x32xf32>, vector<8x32xf32> -> vector<8x32xf32>
    %124 = arith.addf %122, %123 : vector<8x32xf32>
    %125 = vector.broadcast %121 : vector<8x1xf32> to vector<8x32xf32>
    %126 = arith.divf %124, %125 : vector<8x32xf32>
    %cst_75 = arith.constant dense<0.000000e+00> : vector<8x64xf32>
    %127 = tpu.matmul %126, %96, %cst_75 {dimension_numbers = #tpu.dot_dimension_numbers<[1], [0], [0], [1], [0, 0, 1, 1], [], []>} : vector<8x32xf32>, vector<32x64xf32>, vector<8x64xf32> -> vector<8x64xf32>
    %128 = arith.addf %88, %127 : vector<8x64xf32>
    %c2 = arith.constant 2 : index
    %c0_76 = arith.constant 0 : index
    %c0_77 = arith.constant 0 : index
    %129 = vector.load %arg7[%c2, %c0_76, %c0_77] : memref<4x64x32xf32, #tpu.memory_space<vmem>>, vector<1x64x32xf32>
    %130 = vector.shape_cast %129 : vector<1x64x32xf32> to vector<64x32xf32>
    %c2_78 = arith.constant 2 : index
    %c0_79 = arith.constant 0 : index
    %c0_80 = arith.constant 0 : index
    %131 = vector.load %arg8[%c2_78, %c0_79, %c0_80] : memref<4x64x32xf32, #tpu.memory_space<vmem>>, vector<1x64x32xf32>
    %132 = vector.shape_cast %131 : vector<1x64x32xf32> to vector<64x32xf32>
    %c2_81 = arith.constant 2 : index
    %c0_82 = arith.constant 0 : index
    %c0_83 = arith.constant 0 : index
    %133 = vector.load %arg9[%c2_81, %c0_82, %c0_83] : memref<4x64x32xf32, #tpu.memory_space<vmem>>, vector<1x64x32xf32>
    %134 = vector.shape_cast %133 : vector<1x64x32xf32> to vector<64x32xf32>
    %c2_84 = arith.constant 2 : index
    %c0_85 = arith.constant 0 : index
    %c0_86 = arith.constant 0 : index
    %135 = vector.load %arg10[%c2_84, %c0_85, %c0_86] : memref<4x32x64xf32, #tpu.memory_space<vmem>>, vector<1x32x64xf32>
    %136 = vector.shape_cast %135 : vector<1x32x64xf32> to vector<32x64xf32>
    %cst_87 = arith.constant dense<0.000000e+00> : vector<8x32xf32>
    %137 = tpu.matmul %47, %130, %cst_87 {dimension_numbers = #tpu.dot_dimension_numbers<[1], [0], [0], [1], [0, 0, 1, 1], [], []>} : vector<8x64xf32>, vector<64x32xf32>, vector<8x32xf32> -> vector<8x32xf32>
    %cst_88 = arith.constant 0.176776692 : f32
    %138 = vector.broadcast %cst_88 : f32 to vector<8x32xf32>
    %139 = arith.mulf %137, %138 : vector<8x32xf32>
    %cst_89 = arith.constant dense<0.000000e+00> : vector<16x32xf32>
    %140 = tpu.matmul %25, %132, %cst_89 {dimension_numbers = #tpu.dot_dimension_numbers<[1], [0], [0], [1], [0, 0, 1, 1], [], []>} : vector<16x64xf32>, vector<64x32xf32>, vector<16x32xf32> -> vector<16x32xf32>
    %cst_90 = arith.constant dense<0.000000e+00> : vector<8x32xf32>
    %141 = tpu.matmul %47, %132, %cst_90 {dimension_numbers = #tpu.dot_dimension_numbers<[1], [0], [0], [1], [0, 0, 1, 1], [], []>} : vector<8x64xf32>, vector<64x32xf32>, vector<8x32xf32> -> vector<8x32xf32>
    %cst_91 = arith.constant dense<0.000000e+00> : vector<16x32xf32>
    %142 = tpu.matmul %25, %134, %cst_91 {dimension_numbers = #tpu.dot_dimension_numbers<[1], [0], [0], [1], [0, 0, 1, 1], [], []>} : vector<16x64xf32>, vector<64x32xf32>, vector<16x32xf32> -> vector<16x32xf32>
    %cst_92 = arith.constant dense<0.000000e+00> : vector<8x32xf32>
    %143 = tpu.matmul %47, %134, %cst_92 {dimension_numbers = #tpu.dot_dimension_numbers<[1], [0], [0], [1], [0, 0, 1, 1], [], []>} : vector<8x64xf32>, vector<64x32xf32>, vector<8x32xf32> -> vector<8x32xf32>
    %cst_93 = arith.constant dense<0.000000e+00> : vector<8x16xf32>
    %144 = tpu.matmul %139, %140, %cst_93 {dimension_numbers = #tpu.dot_dimension_numbers<[1], [1], [0], [0], [0, 0, 1, 0], [], []>} : vector<8x32xf32>, vector<16x32xf32>, vector<8x16xf32> -> vector<8x16xf32>
    %cst_94 = arith.constant dense<0.000000e+00> : vector<8x8xf32>
    %145 = tpu.matmul %139, %141, %cst_94 {dimension_numbers = #tpu.dot_dimension_numbers<[1], [1], [0], [0], [0, 0, 1, 0], [], []>} : vector<8x32xf32>, vector<8x32xf32>, vector<8x8xf32> -> vector<8x8xf32>
    %cst_95 = arith.constant dense<0xFF800000> : vector<8xf32>
    %146 = vector.multi_reduction <maximumf>, %144, %cst_95 [1] : vector<8x16xf32> to vector<8xf32>
    %147 = vector.shape_cast %146 : vector<8xf32> to vector<8x1xf32>
    %cst_96 = arith.constant dense<0xFF800000> : vector<8xf32>
    %148 = vector.multi_reduction <maximumf>, %145, %cst_96 [1] : vector<8x8xf32> to vector<8xf32>
    %149 = vector.shape_cast %148 : vector<8xf32> to vector<8x1xf32>
    %150 = arith.maximumf %147, %149 : vector<8x1xf32>
    %151 = vector.broadcast %150 : vector<8x1xf32> to vector<8x16xf32>
    %152 = arith.subf %144, %151 : vector<8x16xf32>
    %153 = math.exp %152 : vector<8x16xf32>
    %154 = vector.broadcast %150 : vector<8x1xf32> to vector<8x8xf32>
    %155 = arith.subf %145, %154 : vector<8x8xf32>
    %156 = math.exp %155 : vector<8x8xf32>
    %cst_97 = arith.constant dense<0.000000e+00> : vector<8xf32>
    %157 = vector.multi_reduction <add>, %153, %cst_97 [1] : vector<8x16xf32> to vector<8xf32>
    %158 = vector.shape_cast %157 : vector<8xf32> to vector<8x1xf32>
    %cst_98 = arith.constant dense<0.000000e+00> : vector<8xf32>
    %159 = vector.multi_reduction <add>, %156, %cst_98 [1] : vector<8x8xf32> to vector<8xf32>
    %160 = vector.shape_cast %159 : vector<8xf32> to vector<8x1xf32>
    %161 = arith.addf %158, %160 : vector<8x1xf32>
    %cst_99 = arith.constant dense<0.000000e+00> : vector<8x32xf32>
    %162 = tpu.matmul %153, %142, %cst_99 {dimension_numbers = #tpu.dot_dimension_numbers<[1], [0], [0], [1], [0, 0, 1, 1], [], []>} : vector<8x16xf32>, vector<16x32xf32>, vector<8x32xf32> -> vector<8x32xf32>
    %cst_100 = arith.constant dense<0.000000e+00> : vector<8x32xf32>
    %163 = tpu.matmul %156, %143, %cst_100 {dimension_numbers = #tpu.dot_dimension_numbers<[1], [0], [0], [1], [0, 0, 1, 1], [], []>} : vector<8x8xf32>, vector<8x32xf32>, vector<8x32xf32> -> vector<8x32xf32>
    %164 = arith.addf %162, %163 : vector<8x32xf32>
    %165 = vector.broadcast %161 : vector<8x1xf32> to vector<8x32xf32>
    %166 = arith.divf %164, %165 : vector<8x32xf32>
    %cst_101 = arith.constant dense<0.000000e+00> : vector<8x64xf32>
    %167 = tpu.matmul %166, %136, %cst_101 {dimension_numbers = #tpu.dot_dimension_numbers<[1], [0], [0], [1], [0, 0, 1, 1], [], []>} : vector<8x32xf32>, vector<32x64xf32>, vector<8x64xf32> -> vector<8x64xf32>
    %168 = arith.addf %128, %167 : vector<8x64xf32>
    %c3 = arith.constant 3 : index
    %c0_102 = arith.constant 0 : index
    %c0_103 = arith.constant 0 : index
    %169 = vector.load %arg7[%c3, %c0_102, %c0_103] : memref<4x64x32xf32, #tpu.memory_space<vmem>>, vector<1x64x32xf32>
    %170 = vector.shape_cast %169 : vector<1x64x32xf32> to vector<64x32xf32>
    %c3_104 = arith.constant 3 : index
    %c0_105 = arith.constant 0 : index
    %c0_106 = arith.constant 0 : index
    %171 = vector.load %arg8[%c3_104, %c0_105, %c0_106] : memref<4x64x32xf32, #tpu.memory_space<vmem>>, vector<1x64x32xf32>
    %172 = vector.shape_cast %171 : vector<1x64x32xf32> to vector<64x32xf32>
    %c3_107 = arith.constant 3 : index
    %c0_108 = arith.constant 0 : index
    %c0_109 = arith.constant 0 : index
    %173 = vector.load %arg9[%c3_107, %c0_108, %c0_109] : memref<4x64x32xf32, #tpu.memory_space<vmem>>, vector<1x64x32xf32>
    %174 = vector.shape_cast %173 : vector<1x64x32xf32> to vector<64x32xf32>
    %c3_110 = arith.constant 3 : index
    %c0_111 = arith.constant 0 : index
    %c0_112 = arith.constant 0 : index
    %175 = vector.load %arg10[%c3_110, %c0_111, %c0_112] : memref<4x32x64xf32, #tpu.memory_space<vmem>>, vector<1x32x64xf32>
    %176 = vector.shape_cast %175 : vector<1x32x64xf32> to vector<32x64xf32>
    %cst_113 = arith.constant dense<0.000000e+00> : vector<8x32xf32>
    %177 = tpu.matmul %47, %170, %cst_113 {dimension_numbers = #tpu.dot_dimension_numbers<[1], [0], [0], [1], [0, 0, 1, 1], [], []>} : vector<8x64xf32>, vector<64x32xf32>, vector<8x32xf32> -> vector<8x32xf32>
    %cst_114 = arith.constant 0.176776692 : f32
    %178 = vector.broadcast %cst_114 : f32 to vector<8x32xf32>
    %179 = arith.mulf %177, %178 : vector<8x32xf32>
    %cst_115 = arith.constant dense<0.000000e+00> : vector<16x32xf32>
    %180 = tpu.matmul %25, %172, %cst_115 {dimension_numbers = #tpu.dot_dimension_numbers<[1], [0], [0], [1], [0, 0, 1, 1], [], []>} : vector<16x64xf32>, vector<64x32xf32>, vector<16x32xf32> -> vector<16x32xf32>
    %cst_116 = arith.constant dense<0.000000e+00> : vector<8x32xf32>
    %181 = tpu.matmul %47, %172, %cst_116 {dimension_numbers = #tpu.dot_dimension_numbers<[1], [0], [0], [1], [0, 0, 1, 1], [], []>} : vector<8x64xf32>, vector<64x32xf32>, vector<8x32xf32> -> vector<8x32xf32>
    %cst_117 = arith.constant dense<0.000000e+00> : vector<16x32xf32>
    %182 = tpu.matmul %25, %174, %cst_117 {dimension_numbers = #tpu.dot_dimension_numbers<[1], [0], [0], [1], [0, 0, 1, 1], [], []>} : vector<16x64xf32>, vector<64x32xf32>, vector<16x32xf32> -> vector<16x32xf32>
    %cst_118 = arith.constant dense<0.000000e+00> : vector<8x32xf32>
    %183 = tpu.matmul %47, %174, %cst_118 {dimension_numbers = #tpu.dot_dimension_numbers<[1], [0], [0], [1], [0, 0, 1, 1], [], []>} : vector<8x64xf32>, vector<64x32xf32>, vector<8x32xf32> -> vector<8x32xf32>
    %cst_119 = arith.constant dense<0.000000e+00> : vector<8x16xf32>
    %184 = tpu.matmul %179, %180, %cst_119 {dimension_numbers = #tpu.dot_dimension_numbers<[1], [1], [0], [0], [0, 0, 1, 0], [], []>} : vector<8x32xf32>, vector<16x32xf32>, vector<8x16xf32> -> vector<8x16xf32>
    %cst_120 = arith.constant dense<0.000000e+00> : vector<8x8xf32>
    %185 = tpu.matmul %179, %181, %cst_120 {dimension_numbers = #tpu.dot_dimension_numbers<[1], [1], [0], [0], [0, 0, 1, 0], [], []>} : vector<8x32xf32>, vector<8x32xf32>, vector<8x8xf32> -> vector<8x8xf32>
    %cst_121 = arith.constant dense<0xFF800000> : vector<8xf32>
    %186 = vector.multi_reduction <maximumf>, %184, %cst_121 [1] : vector<8x16xf32> to vector<8xf32>
    %187 = vector.shape_cast %186 : vector<8xf32> to vector<8x1xf32>
    %cst_122 = arith.constant dense<0xFF800000> : vector<8xf32>
    %188 = vector.multi_reduction <maximumf>, %185, %cst_122 [1] : vector<8x8xf32> to vector<8xf32>
    %189 = vector.shape_cast %188 : vector<8xf32> to vector<8x1xf32>
    %190 = arith.maximumf %187, %189 : vector<8x1xf32>
    %191 = vector.broadcast %190 : vector<8x1xf32> to vector<8x16xf32>
    %192 = arith.subf %184, %191 : vector<8x16xf32>
    %193 = math.exp %192 : vector<8x16xf32>
    %194 = vector.broadcast %190 : vector<8x1xf32> to vector<8x8xf32>
    %195 = arith.subf %185, %194 : vector<8x8xf32>
    %196 = math.exp %195 : vector<8x8xf32>
    %cst_123 = arith.constant dense<0.000000e+00> : vector<8xf32>
    %197 = vector.multi_reduction <add>, %193, %cst_123 [1] : vector<8x16xf32> to vector<8xf32>
    %198 = vector.shape_cast %197 : vector<8xf32> to vector<8x1xf32>
    %cst_124 = arith.constant dense<0.000000e+00> : vector<8xf32>
    %199 = vector.multi_reduction <add>, %196, %cst_124 [1] : vector<8x8xf32> to vector<8xf32>
    %200 = vector.shape_cast %199 : vector<8xf32> to vector<8x1xf32>
    %201 = arith.addf %198, %200 : vector<8x1xf32>
    %cst_125 = arith.constant dense<0.000000e+00> : vector<8x32xf32>
    %202 = tpu.matmul %193, %182, %cst_125 {dimension_numbers = #tpu.dot_dimension_numbers<[1], [0], [0], [1], [0, 0, 1, 1], [], []>} : vector<8x16xf32>, vector<16x32xf32>, vector<8x32xf32> -> vector<8x32xf32>
    %cst_126 = arith.constant dense<0.000000e+00> : vector<8x32xf32>
    %203 = tpu.matmul %196, %183, %cst_126 {dimension_numbers = #tpu.dot_dimension_numbers<[1], [0], [0], [1], [0, 0, 1, 1], [], []>} : vector<8x8xf32>, vector<8x32xf32>, vector<8x32xf32> -> vector<8x32xf32>
    %204 = arith.addf %202, %203 : vector<8x32xf32>
    %205 = vector.broadcast %201 : vector<8x1xf32> to vector<8x32xf32>
    %206 = arith.divf %204, %205 : vector<8x32xf32>
    %cst_127 = arith.constant dense<0.000000e+00> : vector<8x64xf32>
    %207 = tpu.matmul %206, %176, %cst_127 {dimension_numbers = #tpu.dot_dimension_numbers<[1], [0], [0], [1], [0, 0, 1, 1], [], []>} : vector<8x32xf32>, vector<32x64xf32>, vector<8x64xf32> -> vector<8x64xf32>
    %208 = arith.addf %168, %207 : vector<8x64xf32>
    %c0_128 = arith.constant 0 : index
    %c0_129 = arith.constant 0 : index
    %c0_130 = arith.constant 0 : index
    %209 = vector.load %arg11[%c0_128, %c0_129, %c0_130] : memref<1x8x64xf32, #tpu.memory_space<vmem>>, vector<1x8x64xf32>
    %210 = vector.shape_cast %209 : vector<1x8x64xf32> to vector<8x64xf32>
    %211 = vector.shape_cast %208 : vector<8x64xf32> to vector<1x8x64xf32>
    tpu.vector_store %arg11[%c0_128, %c0_129, %c0_130], %211 {strides = array<i32>} : memref<1x8x64xf32, #tpu.memory_space<vmem>>, vector<1x8x64xf32>,
    return
  }
  func.func @transform_0(%arg0: i32) -> (i32, i32, i32) {
    %c0_i32 = arith.constant 0 : i32
    %c0_i32_0 = arith.constant 0 : i32
    %c0_i32_1 = arith.constant 0 : i32
    return %arg0, %c0_i32, %c0_i32_0 : i32, i32, i32
  }
  func.func @transform_1(%arg0: i32) -> (i32, i32, i32) {
    %c0_i32 = arith.constant 0 : i32
    %c0_i32_0 = arith.constant 0 : i32
    %c0_i32_1 = arith.constant 0 : i32
    return %arg0, %c0_i32, %c0_i32_0 : i32, i32, i32
  }
  func.func @transform_2(%arg0: i32) -> (i32, i32) {
    %c0_i32 = arith.constant 0 : i32
    %c0_i32_0 = arith.constant 0 : i32
    %c0_i32_1 = arith.constant 0 : i32
    return %c0_i32, %c0_i32_0 : i32, i32
  }
  func.func @transform_3(%arg0: i32) -> (i32, i32) {
    %c0_i32 = arith.constant 0 : i32
    %c0_i32_0 = arith.constant 0 : i32
    %c0_i32_1 = arith.constant 0 : i32
    return %c0_i32, %c0_i32_0 : i32, i32
  }
  func.func @transform_4(%arg0: i32) -> (i32, i32) {
    %c0_i32 = arith.constant 0 : i32
    %c0_i32_0 = arith.constant 0 : i32
    %c0_i32_1 = arith.constant 0 : i32
    return %c0_i32, %c0_i32_0 : i32, i32
  }
  func.func @transform_5(%arg0: i32) -> (i32, i32) {
    %c0_i32 = arith.constant 0 : i32
    %c0_i32_0 = arith.constant 0 : i32
    %c0_i32_1 = arith.constant 0 : i32
    return %c0_i32, %c0_i32_0 : i32, i32
  }
  func.func @transform_6(%arg0: i32) -> (i32, i32, i32) {
    %c0_i32 = arith.constant 0 : i32
    %c0_i32_0 = arith.constant 0 : i32
    %c0_i32_1 = arith.constant 0 : i32
    %c0_i32_2 = arith.constant 0 : i32
    return %c0_i32, %c0_i32_0, %c0_i32_1 : i32, i32, i32
  }
  func.func @transform_7(%arg0: i32) -> (i32, i32, i32) {
    %c0_i32 = arith.constant 0 : i32
    %c0_i32_0 = arith.constant 0 : i32
    %c0_i32_1 = arith.constant 0 : i32
    %c0_i32_2 = arith.constant 0 : i32
    return %c0_i32, %c0_i32_0, %c0_i32_1 : i32, i32, i32
  }
  func.func @transform_8(%arg0: i32) -> (i32, i32, i32) {
    %c0_i32 = arith.constant 0 : i32
    %c0_i32_0 = arith.constant 0 : i32
    %c0_i32_1 = arith.constant 0 : i32
    %c0_i32_2 = arith.constant 0 : i32
    return %c0_i32, %c0_i32_0, %c0_i32_1 : i32, i32, i32
  }
  func.func @transform_9(%arg0: i32) -> (i32, i32, i32) {
    %c0_i32 = arith.constant 0 : i32
    %c0_i32_0 = arith.constant 0 : i32
    %c0_i32_1 = arith.constant 0 : i32
    %c0_i32_2 = arith.constant 0 : i32
    return %c0_i32, %c0_i32_0, %c0_i32_1 : i32, i32, i32
  }
  func.func @transform_10(%arg0: i32) -> (i32, i32, i32) {
    %c0_i32 = arith.constant 0 : i32
    %c0_i32_0 = arith.constant 0 : i32
    %c0_i32_1 = arith.constant 0 : i32
    return %arg0, %c0_i32, %c0_i32_0 : i32, i32, i32
  }
}

</mosaic_0001>

<bundles_post_ra>
// kernel: tpu_custom_call.1
= control target key start
LH: loop header
LB: loop body
LE: loop exit
PB: predicated region body
PF: predicated region fallthrough
CT: control target
= control target key end

     0   :  { %s2762_s0 = inlined_call_operand.vmem [shape: f32[2,16,64], index: 0, kind: input, shape index: {}]   ;;  %s2763_s1 = inlined_call_operand.vmem [shape: f32[2,8,64], index: 1, kind: input, shape index: {}]   ;;  %s2764_s2 = inlined_call_operand.vmem [shape: f32[1,64], index: 2, kind: input, shape index: {}]   ;;  %s2765_s3 = inlined_call_operand.vmem [shape: f32[1,64], index: 3, kind: input, shape index: {}]   ;;  %s2766_s4 = inlined_call_operand.vmem [shape: f32[1,64], index: 4, kind: input, shape index: {}]   ;;  %s2767_s5 = inlined_call_operand.vmem [shape: f32[1,64], index: 5, kind: input, shape index: {}]   ;;  %s2768_s6 = inlined_call_operand.vmem [shape: f32[4,64,32], index: 6, kind: input, shape index: {}]   ;;  %s2769_s7 = inlined_call_operand.vmem [shape: f32[4,64,32], index: 7, kind: input, shape index: {}]   ;;  %s2770_s8 = inlined_call_operand.vmem [shape: f32[4,64,32], index: 8, kind: input, shape index: {}]   ;;  %s2771_s9 = inlined_call_operand.vmem [shape: f32[4,32,64], index: 9, kind: input, shape index: {}]   ;;  %s2772_s10 = inlined_call_operand.hbm [shape: f32[2,8,64], index: 10, kind: output, shape index: {}]  }
   0x1   :  { %2773 = sst [smem:[#allocation5_spill]] %s2762_s0 }
   0x2   :  { %15 = vsyncpa [#allocation3], 0 }
   0x3   :  { %17 = vsyncpa [#allocation3 + $0x1], 0  ;;  %s2105_s13 = smov 0   ;;  %s2107_s14 = smov 0  }
   0x4   :  { %s2109_s15 = smov 0   ;;  %s2111_s16 = smov 0  }
   0x5 LB: > { %s2126_s17 = sadd.s32 4294967295, %s2047_s16   ;;  %s1752_s18 = sadd.s32 4294967294, %s2047_s16   ;;  %s2047_s16 = sphi %s2111_s16, %s2780_s16   ;;  %s2043_s15 = sphi %s2109_s15, %s2779_s15   ;;  %s2039_s14 = sphi %s2107_s14, %s2778_s14   ;;  %s2035_s13 = sphi %s2105_s13, %s2777_s13  }
   0x6   : > { %s2130_s19 = sadd.s32 1, %s2047_s16   ;;  %s250_s20 = sadd.s32 1, %s2043_s15 }
   0x7   : > { %s247_s21 = ssub.s32 %s2047_s16, %s2130_s19  ;;  %p260_p0 = scmp.ne.s32.totalorder %s2043_s15, %s2039_s14 }
   0x8   : > { %p248_p1 = scmp.eq.s32.totalorder %s247_s21, 0  ;;  %p261_p2 = scmp.eq.s32.totalorder %s2126_s17, 1 }
   0x9   : > { %p266_p3 = scmp.ne.s32.totalorder %s2039_s14, %s2035_s13  ;;  %p267_p4 = scmp.eq.s32.totalorder %s1752_s18, 1 }
   0xa   : > { %s2141_s22 = scalar_select %p248_p1, %s2043_s15, %s250_s20  }
   0xb   : > { %p2143_p5 = por %p261_p2, %p260_p0  ;;  %p2147_p6 = por %p267_p4, %p266_p3 }
   0xc   : > { %p1755_p7 = scmp.ge.s32.totalorder %s2047_s16, 1  ;;  %p324_p8 = scmp.lt.s32.totalorder %s2047_s16, 3 }
   0xe   : > { %p325_p9 = pnand %p1755_p7, %p324_p8 }
   0xf   : > { %p366_p10 = scmp.lt.s32.totalorder (!%p325_p9), %s2126_s17, 1  ;;  %s2776_s0 = sld [smem:[#allocation5_spill]] (!%p325_p9) }
  0x10   : > { %328 = sbr.rel (%p325_p9) target bundleno = 2321 (0x911), region = 60  ;;  %s363_s21 = sand.u32 (!%p325_p9), 1, %s2039_s14  }
  0x15   : > { %s367_s25 = scalar_select %p366_p10, %s2126_s17, 1  ;;  %vm380_vm0 = vcmask 523264   ;;  %v2049_v6 = vmov 64.0   ;;  %v489_v28 = vld [vmem:[%s2769_s7 + $0x38] sm:$0xff]  ;;  %v488_v31 = vld [vmem:[%s2769_s7 + $0x30] sm:$0xff]  ;;  %v487_v34 = vld [vmem:[%s2769_s7 + $0x28] sm:$0xff] }
  0x16   : > { %1953 = vrcp.f32 %v2049_v6  ;;  %v497_v29 = vld [vmem:[%s2770_s8 + $0x38] sm:$0xff]  ;;  %540 = vmatpush.msra.mxu1 %v489_v28  ;;  %v496_v32 = vld [vmem:[%s2770_s8 + $0x30] sm:$0xff]  ;;  %563 = vmatpush.msra.mxu2 %v489_v28  ;;  %v495_v35 = vld [vmem:[%s2770_s8 + $0x28] sm:$0xff]  ;;  %vm618_vm11 = vcmask 261120   ;;  %vm671_vm12 = vcmask 130048   ;;  %vm675_vm13 = vcmask 64512  }
  0x17   : > { %s1908_s26 = sshll.u32 %s367_s25, 4  ;;  %s1759_s27 = sshll.u32 %s367_s25, 3  ;;  %583 = vmatpush.msra.mxu3 %v497_v29  ;;  %v481_v30 = vld [vmem:[%s2768_s6 + $0x38] sm:$0xff]  ;;  %v480_v33 = vld [vmem:[%s2768_s6 + $0x30] sm:$0xff]  ;;  %v479_v36 = vld [vmem:[%s2768_s6 + $0x28] sm:$0xff] }
  0x18   : > { %s370_s30 = scalar_lea.vmem %s2776_s0, %s1908_s26  ;;  %s374_s18 = scalar_lea.vmem %s2763_s1, %s1759_s27  ;;  %513 = vmatpush.msra.mxu0 %v481_v30  ;;  %541 = vmatpush.msra.mxu1 %v488_v31  ;;  %v486_v37 = vld [vmem:[%s2769_s7 + $0x20] sm:$0xff]  ;;  %v485_v40 = vld [vmem:[%s2769_s7 + $0x18] sm:$0xff]  ;;  %v484_v43 = vld [vmem:[%s2769_s7 + $0x10] sm:$0xff] }
  0x19   : > { %v375_v0 = vld [vmem:[%s370_s30] sm:$0xff]  ;;  %v376_v4 = vld [vmem:[%s370_s30 + $0x8] sm:$0xff]  ;;  %584 = vmatpush.msra.mxu3 %v496_v32  ;;  %564 = vmatpush.msra.mxu2 %v488_v31  ;;  %v493_v41 = vld [vmem:[%s2770_s8 + $0x18] sm:$0xff]  ;;  %s1756_s25 = sshll.u32 %s363_s21, 3  ;;  %s1905_s26 = sshll.u32 %s2126_s17, 3 }
  0x1a   : > { %v377_v1 = vld [vmem:[%s374_s18] sm:$0xff]  ;;  %v381_v2 = vsel %vm380_vm0, %v375_v0, 0.0  ;;  %v384_v5 = vsel %vm380_vm0, %v376_v4, 0.0  ;;  %514 = vmatpush.msra.mxu0 %v480_v33  ;;  %542 = vmatpush.msra.mxu1 %v487_v34  ;;  %v477_v42 = vld [vmem:[%s2768_s6 + $0x18] sm:$0xff]  ;;  %v492_v44 = vld [vmem:[%s2770_s8 + $0x10] sm:$0xff]  ;;  %s1676_s29 = scalar_lea.hbm %s2772_s10, %s1905_s26  ;;  %s365_s30 = scalar_lea.vmem [#allocation2], %s1756_s25 }
  0x1b   : > { %v444_v3 = vsel %vm380_vm0, %v377_v1, 0.0  ;;  %382 = vadd.xlane.f32.xlu0 %v381_v2  ;;  %585 = vmatpush.msra.mxu3 %v495_v35  ;;  %v494_v38 = vld [vmem:[%s2770_s8 + $0x20] sm:$0xff]  ;;  %v476_v45 = vld [vmem:[%s2768_s6 + $0x10] sm:$0xff]  ;;  %v483_v46 = vld [vmem:[%s2769_s7 + $0x8] sm:$0xff]  ;;  %s1678_s11 = sshll.u32 %s365_s30, 4  ;;  %s1680_s12 = sshll.u32 %s1676_s29, 4  ;;  %s1679_s11 = int_to_ptr.vmem [resolvable:$true] %s1678_s11  ;;  %s1681_s12 = int_to_ptr.hbm [resolvable:$true] %s1680_s12 }
  0x1c   : > { %445 = vadd.xlane.f32.xlu1 %v444_v3  ;;  %v1954_v7 = vpop.eup %1953  ;;  %515 = vmatpush.msra.mxu0 %v479_v36  ;;  %v478_v39 = vld [vmem:[%s2768_s6 + $0x20] sm:$0xff]  ;;  %v491_v47 = vld [vmem:[%s2770_s8 + $0x8] sm:$0xff]  ;;  %v1780_v33 = vld [vmem:[%s2768_s6 + $0x70] sm:$0xff]  ;;  %s1666_s18 = scalar_lea.sflag [#allocation3], %s363_s21  ;;  %s1999_s20 = sshra.s32 %s1681_s12, 4  ;;  %s2000_s20 = int_to_ptr.hbm [resolvable:$true] %s1999_s20 }
  0x1d   : > { %v388_v8 = vmul.f32 64.0, %v1954_v7  ;;  %vm392_vm1 = vweird.f32 %v1954_v7  ;;  %565 = vmatpush.msra.mxu2 %v487_v34  ;;  %543 = vmatpush.msra.mxu1 %v486_v37  ;;  %v475_v48 = vld [vmem:[%s2768_s6 + $0x8] sm:$0xff]  ;;  %v482_v49 = vld [vmem:[%s2769_s7] sm:$0xff]  ;;  %v1776_v36 = vld [vmem:[%s2768_s6 + $0x50] sm:$0xff]  ;;  %s2001_s0 = scalar_lea.hbm %s2000_s20, 8  ;;  %s2005_s25 = scalar_lea.hbm %s2772_s10, 16 }
  0x1e   : > { %586 = vmatpush.msra.mxu3 %v494_v38  ;;  %516 = vmatpush.msra.mxu0 %v478_v39  ;;  %v490_v50 = vld [vmem:[%s2770_s8] sm:$0xff]  ;;  %v1797_v39 = vld [vmem:[%s2770_s8 + $0x78] sm:$0xff]  ;;  %p2002_p11 = scmp.ne.s32.totalorder %s2000_s20, %s2001_s0  ;;  %p2006_p0 = scmp.lt.s32.totalorder %s2000_s20, %s2772_s10 }
  0x1f   : > { %v389_v9 = vsub.f32 1.0, %v388_v8  ;;  %566 = vmatpush.msra.mxu2 %v486_v37  ;;  %544 = vmatpush.msra.mxu1 %v485_v40  ;;  %v474_v51 = vld [vmem:[%s2768_s6] sm:$0xff]  ;;  %v1775_v37 = vld [vmem:[%s2768_s6 + $0x48] sm:$0xff]  ;;  %p2007_p1 = scmp.lt.s32.totalorder %s2005_s25, %s2001_s0 }
  0x20   : > { %587 = vmatpush.msra.mxu3 %v493_v41  ;;  %517 = vmatpush.msra.mxu0 %v477_v42  ;;  %v1950_v8 = vld [vmem:[%s2765_s3] ss:$0 sm:$0xff]  ;;  %p2003_p12 = pnand %p2002_p11, %p2143_p5 }
  0x21   : > { %v390_v10 = vmul.f32 %v1954_v7, %v389_v9  ;;  %567 = vmatpush.msra.mxu2 %v485_v40  ;;  %545 = vmatpush.msra.mxu1 %v484_v43  ;;  %v1952_v28 = vld [vmem:[%s2767_s5] ss:$0 sm:$0xff]  ;;  %v1796_v40 = vld [vmem:[%s2770_s8 + $0x70] sm:$0xff]  ;;  %p2008_p2 = por %p2007_p1, %p2006_p0 }
  0x22   : > { %588 = vmatpush.msra.mxu3 %v492_v44  ;;  %518 = vmatpush.msra.mxu0 %v476_v45  ;;  %v1778_v34 = vld [vmem:[%s2768_s6 + $0x60] sm:$0xff]  ;;  %v1791_v45 = vld [vmem:[%s2770_s8 + $0x48] sm:$0xff]  ;;  %p2004_p13 = pneg %p2003_p12 }
  0x23   : > { %385 = vadd.xlane.f32.xlu0 %v384_v5  ;;  %v391_v11 = vadd.f32 %v1954_v7, %v390_v10  ;;  %568 = vmatpush.msra.mxu2 %v484_v43  ;;  %v1949_v5 = vld [vmem:[%s2764_s2] ss:$0 sm:$0xff]  ;;  %v1793_v43 = vld [vmem:[%s2770_s8 + $0x58] sm:$0xff] }
  0x24   : > { %546 = vmatpush.msra.mxu1 %v483_v46  ;;  %589 = vmatpush.msra.mxu3 %v491_v47  ;;  %v1794_v42 = vld [vmem:[%s2770_s8 + $0x60] sm:$0xff]  ;;  %p2009_p3 = pnand %p2008_p2, %p2004_p13 }
  0x25   : > { %v2164_v12 = vsel %vm392_vm1, %v1954_v7, %v391_v11  ;;  %519 = vmatpush.msra.mxu0 %v475_v48  ;;  %569 = vmatpush.msra.mxu2 %v483_v46  ;;  %v1790_v46 = vld [vmem:[%s2770_s8 + $0x40] sm:$0xff] }
  0x26   : > { %547 = vmatpush.msra.mxu1 %v482_v49  ;;  %590 = vmatpush.msra.mxu3 %v490_v50 }
  0x27   : > { %520 = vmatpush.msra.mxu0 %v474_v51  ;;  %570 = vmatpush.msra.mxu2 %v482_v49 }
  0x29   : > { %606 = vmatpush.msrb.mxu0 %v497_v29 }
  0x2b   : > { %607 = vmatpush.msrb.mxu0 %v496_v32  ;;  %v1781_v32 = vld [vmem:[%s2768_s6 + $0x78] sm:$0xff] }
  0x2d   : > { %608 = vmatpush.msrb.mxu0 %v495_v35  ;;  %v1777_v35 = vld [vmem:[%s2768_s6 + $0x58] sm:$0xff] }
  0x2f   : > { %609 = vmatpush.msrb.mxu0 %v494_v38  ;;  %v1774_v38 = vld [vmem:[%s2768_s6 + $0x40] sm:$0xff] }
  0x31   : > { %610 = vmatpush.msrb.mxu0 %v493_v41  ;;  %v1795_v41 = vld [vmem:[%s2770_s8 + $0x68] sm:$0xff] }
  0x33   : > { %611 = vmatpush.msrb.mxu0 %v492_v44  ;;  %v1792_v44 = vld [vmem:[%s2770_s8 + $0x50] sm:$0xff] }
  0x35   : > { %612 = vmatpush.msrb.mxu0 %v491_v47 }
  0x37   : > { %613 = vmatpush.msrb.mxu0 %v490_v50 }
  0x8e   : > { %v383_v13 = vpop.xlane.xlu0 %382 }
  0x8f   : > { %v394_v14 = vmul.f32 %v2164_v12, %v383_v13  ;;  %v446_v17 = vpop.xlane.xlu1 %445 }
  0x90   : > { %v447_v21 = vmul.f32 %v446_v17, %v2164_v12 }
  0x91   : > { %v2167_v15 = vsub.f32 %v375_v0, %v394_v14 }
  0x92   : > { %v2176_v23 = vsub.f32 %v377_v1, %v447_v21 }
  0x93   : > { %v398_v16 = vmul.f32 %v2167_v15, %v2167_v15 }
  0x94   : > { %v449_v26 = vmul.f32 %v2176_v23, %v2176_v23 }
  0x95   : > { %v400_v18 = vsel %vm380_vm0, %v398_v16, 0.0 }
  0x96   : > { %401 = vadd.xlane.f32.xlu1 %v400_v18  ;;  %v386_v19 = vpop.xlane.xlu0 %385  ;;  %v450_v27 = vsel %vm380_vm0, %v449_v26, 0.0 }
  0x97   : > { %v395_v20 = vmul.f32 %v2164_v12, %v386_v19 }
  0x99   : > { %v2174_v22 = vsub.f32 %v376_v4, %v395_v20 }
  0x9b   : > { %v399_v24 = vmul.f32 %v2174_v22, %v2174_v22 }
  0x9d   : > { %v403_v25 = vsel %vm380_vm0, %v399_v24, 0.0 }
  0x9e   : > { %404 = vadd.xlane.f32.xlu2 %v403_v25 }
  0xa6   : > { %451 = vadd.xlane.f32.xlu2 %v450_v27  ;;  %v1951_v27 = vld [vmem:[%s2766_s4] ss:$0 sm:$0xff] }
 0x109   : > { %v402_v52 = vpop.xlane.xlu1 %401 }
 0x10a   : > { %v406_v53 = vmul.f32 %v402_v52, %v2164_v12 }
 0x10c   : > { %v408_v54 = vadd.f32 1e-05, %v406_v53  ;;  %v1789_v53 = vld [vmem:[%s2769_s7 + $0x78] sm:$0xff] }
 0x10e   : > { %1955 = vrsqrt.f32 %v408_v54  ;;  %vm416_vm3 = vweird.f32 %v408_v54 }
 0x111   : > { %v405_v55 = vpop.xlane.xlu2 %404 }
 0x112   : > { %v407_v56 = vmul.f32 %v405_v55, %v2164_v12 }
 0x114   : > { %v1956_v57 = vpop.eup %1955  ;;  %v409_v58 = vadd.f32 1e-05, %v407_v56  ;;  %v1788_v56 = vld [vmem:[%s2769_s7 + $0x70] sm:$0xff] }
 0x115   : > { %v411_v59 = vmul.f32 %v1956_v57, %v408_v54  ;;  %vm417_vm2 = vweird.f32 %v1956_v57 }
 0x116   : > { %1957 = vrsqrt.f32 %v409_v58  ;;  %vm418_vm4 = vmor %vm416_vm3, %vm417_vm2  ;;  %vm426_vm6 = vweird.f32 %v409_v58 }
 0x117   : > { %v412_v60 = vmul.f32 %v1956_v57, %v411_v59  ;;  %v1785_v59 = vld [vmem:[%s2769_s7 + $0x58] sm:$0xff] }
 0x119   : > { %v413_v61 = vmul.f32 0.5, %v412_v60  ;;  %v452_v62 = vpop.xlane.xlu2 %451  ;;  %v1784_v60 = vld [vmem:[%s2769_s7 + $0x50] sm:$0xff] }
 0x11a   : > { %v453_v63 = vmul.f32 %v452_v62, %v2164_v12  ;;  %v1782_v62 = vld [vmem:[%s2769_s7 + $0x40] sm:$0xff] }
 0x11b   : > { %v414_v0 = vsub.f32 1.5, %v413_v61  ;;  %v1783_v61 = vld [vmem:[%s2769_s7 + $0x48] sm:$0xff] }
 0x11c   : > { %v1958_v1 = vpop.eup %1957  ;;  %v454_v2 = vadd.f32 1e-05, %v453_v63 }
 0x11d   : > { %v415_v3 = vmul.f32 %v1956_v57, %v414_v0  ;;  %v421_v4 = vmul.f32 %v1958_v1, %v409_v58  ;;  %vm427_vm5 = vweird.f32 %v1958_v1  ;;  %v1786_v58 = vld [vmem:[%s2769_s7 + $0x60] sm:$0xff] }
 0x11e   : > { %1959 = vrsqrt.f32 %v454_v2  ;;  %vm428_vm7 = vmor %vm426_vm6, %vm427_vm5  ;;  %vm461_vm9 = vweird.f32 %v454_v2 }
 0x11f   : > { %v419_v6 = vsel %vm418_vm4, %v1956_v57, %v415_v3  ;;  %v422_v7 = vmul.f32 %v1958_v1, %v421_v4  ;;  %v1787_v57 = vld [vmem:[%s2769_s7 + $0x68] sm:$0xff] }
 0x120   : > { %v430_v9 = vmul.f32 %v419_v6, %v2167_v15 }
 0x121   : > { %v423_v10 = vmul.f32 0.5, %v422_v7 }
 0x122   : > { %v435_v11 = vmul.f32 %v1949_v5, %v430_v9 }
 0x123   : > { %v424_v12 = vsub.f32 1.5, %v423_v10 }
 0x124   : > { %v1960_v13 = vpop.eup %1959  ;;  %v2266_v14 = vadd.f32 %v1950_v8, %v435_v11 }
 0x125   : > { %v425_v16 = vmul.f32 %v1958_v1, %v424_v12  ;;  %v456_v17 = vmul.f32 %v1960_v13, %v454_v2  ;;  %vm462_vm8 = vweird.f32 %v1960_v13 }
 0x126   : > { %1761 = vmatmul.msk.f32.vlgmr.msra.gmra.mxu1 %vm380_vm0, %v2266_v14  ;;  %1764 = vmatmul.msk.f32.vlgmr.msra.gmra.mxu3 %vm380_vm0, %v2266_v14  ;;  %vm463_vm10 = vmor %vm461_vm9, %vm462_vm8 }
 0x127   : > { %v429_v18 = vsel %vm428_vm7, %v1958_v1, %v425_v16  ;;  %v457_v19 = vmul.f32 %v1960_v13, %v456_v17 }
 0x128   : > { %v431_v15 = vmul.f32 %v429_v18, %v2174_v22 }
 0x129   : > { %v458_v20 = vmul.f32 0.5, %v457_v19 }
 0x12a   : > { %v436_v21 = vmul.f32 %v1949_v5, %v431_v15 }
 0x12b   : > { %v459_v24 = vsub.f32 1.5, %v458_v20 }
 0x12c   : > { %v2273_v25 = vadd.f32 %v1950_v8, %v436_v21 }
 0x12d   : > { %v460_v26 = vmul.f32 %v1960_v13, %v459_v24 }
 0x12e   : > { %1762 = vmatmul.msk.f32.gmra.mxu1 %vm380_vm0, %v2273_v25  ;;  %1765 = vmatmul.msk.f32.gmra.mxu3 %vm380_vm0, %v2273_v25 }
 0x12f   : > { %v464_v22 = vsel %vm463_vm10, %v1960_v13, %v460_v26 }
 0x130   : > { %v465_v29 = vmul.f32 %v464_v22, %v2176_v23  ;;  %v1779_v23 = vld [vmem:[%s2768_s6 + $0x68] sm:$0xff] }
 0x132   : > { %v469_v30 = vmul.f32 %v1951_v27, %v465_v29 }
 0x134   : > { %v2286_v31 = vadd.f32 %v1952_v28, %v469_v30  ;;  %v1825_v28 = vld [vmem:[%s2768_s6 + $0xb8] sm:$0xff] }
 0x136   : > { %1760 = vmatmul.msk.f32.vlgmr.msra.gmra.mxu0 %vm380_vm0, %v2286_v31  ;;  %1763 = vmatmul.msk.f32.vlgmr.msra.gmra.mxu2 %vm380_vm0, %v2286_v31 }
 0x137   : > { %794 = vmatpush.msra.mxu0 %v1781_v32 }
 0x139   : > { %795 = vmatpush.msra.mxu0 %v1780_v33  ;;  %v1824_v33 = vld [vmem:[%s2768_s6 + $0xb0] sm:$0xff] }
 0x13b   : > { %796 = vmatpush.msra.mxu0 %v1779_v23  ;;  %v1823_v23 = vld [vmem:[%s2768_s6 + $0xa8] sm:$0xff] }
 0x13d   : > { %797 = vmatpush.msra.mxu0 %v1778_v34  ;;  %v1822_v34 = vld [vmem:[%s2768_s6 + $0xa0] sm:$0xff] }
 0x13e   : > { %1766 = vmatmul.msk.f32.vlgmr.msrb.gmra.mxu0 %vm380_vm0, %v2286_v31 }
 0x13f   : > { %798 = vmatpush.msra.mxu0 %v1777_v35  ;;  %v2417_v35 = vld [vmem:[%s2769_s7 + $0xb8] sm:$0xff] }
 0x141   : > { %799 = vmatpush.msra.mxu0 %v1776_v36  ;;  %v1821_v36 = vld [vmem:[%s2768_s6 + $0x98] sm:$0xff] }
 0x143   : > { %800 = vmatpush.msra.mxu0 %v1775_v37  ;;  %v2426_v37 = vld [vmem:[%s2769_s7 + $0xb0] sm:$0xff] }
 0x145   : > { %801 = vmatpush.msra.mxu0 %v1774_v38  ;;  %v1820_v38 = vld [vmem:[%s2768_s6 + $0x90] sm:$0xff] }
 0x146   : > { %1802 = vmatmul.msk.f32.vlgmr.msra.gmra.mxu0 %vm380_vm0, %v2286_v31 }
 0x147   : > { %881 = vmatpush.msrb.mxu0 %v1797_v39 }
 0x149   : > { %882 = vmatpush.msrb.mxu0 %v1796_v40 }
 0x14b   : > { %883 = vmatpush.msrb.mxu0 %v1795_v41 }
 0x14d   : > { %884 = vmatpush.msrb.mxu0 %v1794_v42 }
 0x14f   : > { %885 = vmatpush.msrb.mxu0 %v1793_v43 }
 0x151   : > { %886 = vmatpush.msrb.mxu0 %v1792_v44 }
 0x153   : > { %887 = vmatpush.msrb.mxu0 %v1791_v45 }
 0x155   : > { %888 = vmatpush.msrb.mxu0 %v1790_v46 }
 0x156   : > { %1808 = vmatmul.msk.f32.vlgmr.msrb.gmra.mxu0 %vm380_vm0, %v2286_v31 }
 0x1a3   : > { %v549_v47 = vpop.f32.mrf.mxu1 }
 0x1a9   : > { %v592_v48 = vpop.f32.mrf.mxu3 }
 0x1ab   : > { %v552_v49 = vpop.f32.mrf.mxu1 }
 0x1ac   : > { %1767 = vmatpush.xpose.msk.msrb.mxu2 %vm618_vm11, %v552_v49 }
 0x1b0   : > { %1768 = vmatpush.xpose.msk.msrb.mxu2 %vm618_vm11, %v549_v47 }
 0x1b1   : > { %v595_v50 = vpop.f32.mrf.mxu3 }
 0x1b2   : > { %733 = vmatpush.msrb.mxu3 %v595_v50 }
 0x1b3   : > { %v522_v51 = vpop.f32.mrf.mxu0 }
 0x1b4   : > { %v525_v52 = vmul.f32 0.17677669, %v522_v51  ;;  %734 = vmatpush.msrb.mxu3 %v592_v48 }
 0x1b6   : > { %858 = vmatpush.msra.mxu3 %v1797_v39  ;;  %1769 = vmatmul.msk.f32.vlgmr.msrb.gmra.mxu2 %vm618_vm11, %v525_v52  ;;  %v2434_v39 = vld [vmem:[%s2769_s7 + $0xa8] sm:$0xff] }
 0x1b8   : > { %859 = vmatpush.msra.mxu3 %v1796_v40  ;;  %v1819_v40 = vld [vmem:[%s2768_s6 + $0x88] sm:$0xff] }
 0x1b9   : > { %v572_v54 = vpop.f32.mrf.mxu2 }
 0x1ba   : > { %860 = vmatpush.msra.mxu3 %v1795_v41  ;;  %1770 = vmatpush.xpose.msk.msrb.mxu1 %vm618_vm11, %v572_v54  ;;  %v2443_v41 = vld [vmem:[%s2769_s7 + $0xa0] sm:$0xff] }
 0x1bb   : > { %v615_v55 = vpop.f32.mrf.mxu0 }
 0x1bc   : > { %861 = vmatpush.msra.mxu3 %v1794_v42  ;;  %711 = vmatpush.msra.mxu2 %v615_v55  ;;  %v1818_v42 = vld [vmem:[%s2768_s6 + $0x80] sm:$0xff]  ;;  %v1841_v55 = vld [vmem:[%s2770_s8 + $0xb8] sm:$0xff] }
 0x1bd   : > { %1771 = vmatmul.msk.f32.vlgmr.msrb.gmra.mxu1 %vm618_vm11, %v525_v52 }
 0x1be   : > { %815 = vmatpush.msra.mxu1 %v1789_v53  ;;  %838 = vmatpush.msrb.mxu2 %v1789_v53 }
 0x1bf   : > { %862 = vmatpush.msra.mxu3 %v1793_v43  ;;  %v2453_v43 = vld [vmem:[%s2769_s7 + $0x98] sm:$0xff] }
 0x1c0   : > { %816 = vmatpush.msra.mxu1 %v1788_v56  ;;  %839 = vmatpush.msrb.mxu2 %v1788_v56 }
 0x1c1   : > { %863 = vmatpush.msra.mxu3 %v1792_v44  ;;  %v2459_v44 = vld [vmem:[%s2769_s7 + $0x90] sm:$0xff] }
 0x1c2   : > { %817 = vmatpush.msra.mxu1 %v1787_v57  ;;  %840 = vmatpush.msrb.mxu2 %v1787_v57 }
 0x1c3   : > { %864 = vmatpush.msra.mxu3 %v1791_v45  ;;  %v803_v13 = vpop.f32.mrf.mxu0  ;;  %v2465_v45 = vld [vmem:[%s2769_s7 + $0x88] sm:$0xff] }
 0x1c4   : > { %818 = vmatpush.msra.mxu1 %v1786_v58  ;;  %841 = vmatpush.msrb.mxu2 %v1786_v58  ;;  %v806_v18 = vmul.f32 0.17677669, %v803_v13 }
 0x1c5   : > { %865 = vmatpush.msra.mxu3 %v1790_v46  ;;  %v2471_v46 = vld [vmem:[%s2769_s7 + $0x80] sm:$0xff] }
 0x1c6   : > { %819 = vmatpush.msra.mxu1 %v1785_v59  ;;  %842 = vmatpush.msrb.mxu2 %v1785_v59  ;;  %v1840_v59 = vld [vmem:[%s2770_s8 + $0xb0] sm:$0xff] }
 0x1c8   : > { %820 = vmatpush.msra.mxu1 %v1784_v60  ;;  %843 = vmatpush.msrb.mxu2 %v1784_v60  ;;  %v1839_v60 = vld [vmem:[%s2770_s8 + $0xa8] sm:$0xff] }
 0x1ca   : > { %821 = vmatpush.msra.mxu1 %v1783_v61  ;;  %844 = vmatpush.msrb.mxu2 %v1783_v61  ;;  %v1838_v61 = vld [vmem:[%s2770_s8 + $0xa0] sm:$0xff] }
 0x1cc   : > { %822 = vmatpush.msra.mxu1 %v1782_v62  ;;  %845 = vmatpush.msrb.mxu2 %v1782_v62  ;;  %v1837_v62 = vld [vmem:[%s2770_s8 + $0x98] sm:$0xff] }
 0x1cd   : > { %1803 = vmatmul.msk.f32.vlgmr.msra.gmra.mxu1 %vm380_vm0, %v2266_v14 }
 0x1d3   : > { %v890_v17 = vpop.f32.mrf.mxu0 }
 0x1d5   : > { %1804 = vmatmul.msk.f32.gmra.mxu1 %vm380_vm0, %v2273_v25 }
 0x239   : > { %v645_v63 = vpop.f32.mrf.mxu2 }
 0x23a   : > { %v668_v0 = vpop.f32.mrf.mxu1  ;;  %v672_v1 = vsel %vm671_vm12, %v645_v63, -inf }
 0x23b   : > { %673 = vmax.xlane.f32.xlu0 %v672_v1  ;;  %v676_v2 = vsel %vm675_vm13, %v668_v0, -inf  ;;  %v1835_v1 = vld [vmem:[%s2770_s8 + $0x88] sm:$0xff] }
 0x23c   : > { %677 = vmax.xlane.f32.xlu1 %v676_v2  ;;  %v1834_v2 = vld [vmem:[%s2770_s8 + $0x80] sm:$0xff] }
 0x24a   : > { %v824_v8 = vpop.f32.mrf.mxu1 }
 0x252   : > { %v827_v16 = vpop.f32.mrf.mxu1 }
 0x2ae   : > { %v674_v3 = vpop.xlane.xlu0 %673 }
 0x2af   : > { %v678_v4 = vpop.xlane.xlu1 %677 }
 0x2b0   : > { %v679_v5 = vmax.f32 %v674_v3, %v678_v4  ;;  %v1801_v3 = vld [vmem:[%s2771_s9 + $0x38] sm:$0xff]  ;;  %v1800_v4 = vld [vmem:[%s2771_s9 + $0x30] sm:$0xff] }
 0x2b1   : > { %1041 = vmatpush.msra.mxu0 %v1801_v3  ;;  %v2598_v3 = vld [vmem:[%s2770_s8 + $0xf0] sm:$0xff] }
 0x2b2   : > { %v680_v6 = vsub.f32 %v645_v63, %v679_v5  ;;  %v683_v7 = vsub.f32 %v668_v0, %v679_v5  ;;  %v1836_v0 = vld [vmem:[%s2770_s8 + $0x90] sm:$0xff]  ;;  %v1799_v5 = vld [vmem:[%s2771_s9 + $0x28] sm:$0xff] }
 0x2b3   : > { %1042 = vmatpush.msra.mxu0 %v1800_v4  ;;  %v2604_v4 = vld [vmem:[%s2770_s8 + $0xe8] sm:$0xff] }
 0x2b4   : > { %v681_v9 = vmul.f32 1.442695, %v680_v6  ;;  %v684_v10 = vmul.f32 1.442695, %v683_v7  ;;  %v1798_v6 = vld [vmem:[%s2771_s9 + $0x20] sm:$0xff]  ;;  %v501_v7 = vld [vmem:[%s2771_s9 + $0x18] sm:$0xff] }
 0x2b5   : > { %1043 = vmatpush.msra.mxu0 %v1799_v5  ;;  %v2610_v5 = vld [vmem:[%s2770_s8 + $0xe0] sm:$0xff] }
 0x2b6   : > { %1961 = vpow2.f32 %v681_v9  ;;  %v499_v9 = vld [vmem:[%s2771_s9 + $0x8] sm:$0xff] }
 0x2b7   : > { %1963 = vpow2.f32 %v684_v10  ;;  %1044 = vmatpush.msra.mxu0 %v1798_v6  ;;  %v498_v10 = vld [vmem:[%s2771_s9] sm:$0xff]  ;;  %v2616_v6 = vld [vmem:[%s2770_s8 + $0xd8] sm:$0xff] }
 0x2b9   : > { %1156 = vmatpush.msrb.mxu0 %v2417_v35 }
 0x2bb   : > { %1157 = vmatpush.msrb.mxu0 %v2426_v37 }
 0x2bc   : > { %v1962_v11 = vpop.eup %1961 }
 0x2bd   : > { %v2381_v12 = vpop.eup %1963  ;;  %1773 = vmatmul.msk.f32.vlgmr.msrb.gmra.mxu3 %vm671_vm12, %v1962_v11  ;;  %v686_v32 = vsel %vm671_vm12, %v1962_v11, 0.0  ;;  %1158 = vmatpush.msrb.mxu0 %v2434_v39 }
 0x2be   : > { %1772 = vmatmul.msk.f32.vlgmr.msra.gmra.mxu2 %vm675_vm13, %v2381_v12  ;;  %v689_v63 = vsel %vm675_vm13, %v2381_v12, 0.0 }
 0x2bf   : > { %1809 = vmatpush.xpose.msk.msra.mxu2 %vm618_vm11, %v827_v16  ;;  %1159 = vmatpush.msrb.mxu0 %v2443_v41 }
 0x2c1   : > { %1160 = vmatpush.msrb.mxu0 %v2453_v43 }
 0x2c3   : > { %1810 = vmatpush.xpose.msk.msra.mxu2 %vm618_vm11, %v824_v8  ;;  %v500_v8 = vld [vmem:[%s2771_s9 + $0x10] sm:$0xff]  ;;  %1161 = vmatpush.msrb.mxu0 %v2459_v44 }
 0x2c5   : > { %1806 = vmatmul.msk.f32.vlgmr.msra.gmra.mxu3 %vm380_vm0, %v2266_v14  ;;  %1162 = vmatpush.msrb.mxu0 %v2465_v45 }
 0x2c6   : > { %1805 = vmatmul.msk.f32.vlgmr.msrb.gmra.mxu2 %vm380_vm0, %v2286_v31 }
 0x2c7   : > { %983 = vmatpush.msrb.mxu2 %v890_v17  ;;  %1163 = vmatpush.msrb.mxu0 %v2471_v46 }
 0x2cd   : > { %1807 = vmatmul.msk.f32.gmra.mxu3 %vm380_vm0, %v2273_v25 }
 0x2ce   : > { %1811 = vmatmul.msk.f32.vlgmr.msra.gmra.mxu2 %vm618_vm11, %v806_v18 }
 0x2cf   : > { %1112 = vmatpush.msra.mxu2 %v1825_v28 }
 0x2d1   : > { %1113 = vmatpush.msra.mxu2 %v1824_v33 }
 0x2d3   : > { %1114 = vmatpush.msra.mxu2 %v1823_v23 }
 0x2d5   : > { %1115 = vmatpush.msra.mxu2 %v1822_v34 }
 0x2d7   : > { %1116 = vmatpush.msra.mxu2 %v1821_v36 }
 0x2d9   : > { %1117 = vmatpush.msra.mxu2 %v1820_v38 }
 0x2db   : > { %1118 = vmatpush.msra.mxu2 %v1819_v40 }
 0x2dd   : > { %1119 = vmatpush.msra.mxu2 %v1818_v42 }
 0x340   : > { %v736_v19 = vpop.f32.mrf.mxu3 }
 0x341   : > { %v713_v15 = vpop.f32.mrf.mxu2 }
 0x342   : > { %v2395_v20 = vadd.f32 %v736_v19, %v713_v15 }
 0x348   : > { %v867_v21 = vpop.f32.mrf.mxu3 }
 0x349   : > { %v847_v24 = vpop.f32.mrf.mxu2 }
 0x34a   : > { %1812 = vmatpush.xpose.msk.msrb.mxu1 %vm618_vm11, %v847_v24 }
 0x34d   : > { %1813 = vmatmul.msk.f32.vlgmr.msrb.gmra.mxu1 %vm618_vm11, %v806_v18 }
 0x34e   : > { %1064 = vmatpush.msra.mxu1 %v501_v7  ;;  %v2622_v7 = vld [vmem:[%s2770_s8 + $0xd0] sm:$0xff] }
 0x350   : > { %v870_v26 = vpop.f32.mrf.mxu3  ;;  %1065 = vmatpush.msra.mxu1 %v500_v8  ;;  %v2628_v8 = vld [vmem:[%s2770_s8 + $0xc8] sm:$0xff] }
 0x351   : > { %v919_v27 = vpop.f32.mrf.mxu2  ;;  %1005 = vmatpush.msrb.mxu3 %v870_v26 }
 0x352   : > { %v945_v22 = vsel %vm671_vm12, %v919_v27, -inf  ;;  %1066 = vmatpush.msra.mxu1 %v499_v9  ;;  %v2634_v9 = vld [vmem:[%s2770_s8 + $0xc0] sm:$0xff] }
 0x353   : > { %946 = vmax.xlane.f32.xlu2 %v945_v22  ;;  %1006 = vmatpush.msrb.mxu3 %v867_v21 }
 0x354   : > { %1067 = vmatpush.msra.mxu1 %v498_v10 }
 0x355   : > { %1133 = vmatpush.msra.mxu3 %v2417_v35 }
 0x356   : > { %1176 = vmatpush.msrb.mxu1 %v1841_v55 }
 0x357   : > { %1134 = vmatpush.msra.mxu3 %v2426_v37 }
 0x358   : > { %1177 = vmatpush.msrb.mxu1 %v1840_v59 }
 0x359   : > { %1135 = vmatpush.msra.mxu3 %v2434_v39 }
 0x35a   : > { %1178 = vmatpush.msrb.mxu1 %v1839_v60 }
 0x35b   : > { %1136 = vmatpush.msra.mxu3 %v2443_v41 }
 0x35c   : > { %1179 = vmatpush.msrb.mxu1 %v1838_v61 }
 0x35d   : > { %1137 = vmatpush.msra.mxu3 %v2453_v43 }
 0x35e   : > { %1180 = vmatpush.msrb.mxu1 %v1837_v62 }
 0x35f   : > { %1138 = vmatpush.msra.mxu3 %v2459_v44 }
 0x360   : > { %1181 = vmatpush.msrb.mxu1 %v1836_v0 }
 0x361   : > { %1139 = vmatpush.msra.mxu3 %v2465_v45 }
 0x362   : > { %1182 = vmatpush.msrb.mxu1 %v1835_v1 }
 0x363   : > { %1140 = vmatpush.msra.mxu3 %v2471_v46 }
 0x364   : > { %1183 = vmatpush.msrb.mxu1 %v1834_v2 }
 0x3c6   : > { %v947_v47 = vpop.xlane.xlu2 %946 }
 0x3ca   : > { %v942_v29 = vpop.f32.mrf.mxu1 }
 0x3cb   : > { %v948_v30 = vsel %vm675_vm13, %v942_v29, -inf }
 0x3cc   : > { %949 = vmax.xlane.f32.xlu0 %v948_v30 }
 0x3d4   : > { %687 = vadd.xlane.f32.xlu0 %v686_v32 }
 0x43f   : > { %v950_v48 = vpop.xlane.xlu0 %949 }
 0x440   : > { %v951_v49 = vmax.f32 %v947_v47, %v950_v48 }
 0x442   : > { %v952_v50 = vsub.f32 %v919_v27, %v951_v49  ;;  %v955_v51 = vsub.f32 %v942_v29, %v951_v49 }
 0x444   : > { %v953_v52 = vmul.f32 1.442695, %v952_v50  ;;  %v956_v53 = vmul.f32 1.442695, %v955_v51 }
 0x446   : > { %1965 = vpow2.f32 %v953_v52  ;;  %v1868_v52 = vld [vmem:[%s2768_s6 + $0xf8] sm:$0xff] }
 0x447   : > { %1967 = vpow2.f32 %v956_v53  ;;  %v688_v16 = vpop.xlane.xlu0 %687 }
 0x44c   : > { %v1966_v54 = vpop.eup %1965 }
 0x44d   : > { %v1968_v56 = vpop.eup %1967  ;;  %1815 = vmatmul.msk.f32.vlgmr.msrb.gmra.mxu3 %vm671_vm12, %v1966_v54  ;;  %v958_v57 = vsel %vm671_vm12, %v1966_v54, 0.0 }
 0x44e   : > { %1814 = vmatmul.msk.f32.vlgmr.msrb.gmra.mxu2 %vm675_vm13, %v1968_v56  ;;  %v961_v58 = vsel %vm675_vm13, %v1968_v56, 0.0  ;;  %959 = vadd.xlane.f32.xlu1 %v958_v57  ;;  %v1866_v56 = vld [vmem:[%s2768_s6 + $0xe8] sm:$0xff]  ;;  %v1865_v57 = vld [vmem:[%s2768_s6 + $0xe0] sm:$0xff] }
 0x44f   : > { %1199 = vmatpush.msrb.mxu2 %v1841_v55  ;;  %962 = vadd.xlane.f32.xlu2 %v961_v58  ;;  %v1867_v55 = vld [vmem:[%s2768_s6 + $0xf0] sm:$0xff] }
 0x451   : > { %1200 = vmatpush.msrb.mxu2 %v1840_v59 }
 0x453   : > { %1201 = vmatpush.msrb.mxu2 %v1839_v60  ;;  %v1864_v60 = vld [vmem:[%s2768_s6 + $0xd8] sm:$0xff] }
 0x455   : > { %1202 = vmatpush.msrb.mxu2 %v1838_v61  ;;  %1847 = vmatmul.msk.f32.vlgmr.msra.gmra.mxu3 %vm380_vm0, %v2266_v14 }
 0x456   : > { %1846 = vmatmul.msk.f32.vlgmr.msra.gmra.mxu2 %vm380_vm0, %v2286_v31  ;;  %690 = vadd.xlane.f32.xlu1 %v689_v63  ;;  %v1862_v63 = vld [vmem:[%s2768_s6 + $0xc8] sm:$0xff] }
 0x457   : > { %1203 = vmatpush.msrb.mxu2 %v1837_v62  ;;  %v1863_v62 = vld [vmem:[%s2768_s6 + $0xd0] sm:$0xff] }
 0x459   : > { %1204 = vmatpush.msrb.mxu2 %v1836_v0  ;;  %v1861_v0 = vld [vmem:[%s2768_s6 + $0xc0] sm:$0xff] }
 0x45b   : > { %1205 = vmatpush.msrb.mxu2 %v1835_v1 }
 0x45d   : > { %1206 = vmatpush.msrb.mxu2 %v1834_v2  ;;  %1848 = vmatmul.msk.f32.gmra.mxu3 %vm380_vm0, %v2273_v25  ;;  %v2591_v2 = vld [vmem:[%s2770_s8 + $0xf8] sm:$0xff] }
 0x45e   : > { %1852 = vmatmul.msk.f32.vlgmr.msrb.gmra.mxu2 %vm380_vm0, %v2286_v31 }
 0x4c1   : > { %v960_v11 = vpop.xlane.xlu1 %959 }
 0x4c2   : > { %v963_v12 = vpop.xlane.xlu2 %962 }
 0x4c3   : > { %v964_v13 = vadd.f32 %v963_v12, %v960_v11  ;;  %v1876_v12 = vld [vmem:[%s2769_s7 + $0xf8] sm:$0xff] }
 0x4c5   : > { %1969 = vrcp.f32 %v964_v13  ;;  %v1022_v24 = vand.u32 2147483648, %v964_v13  ;;  %v1020_v22 = vand.u32 2147483647, %v964_v13  ;;  %vm1016_vm15 = vweird.f32 %v964_v13 }
 0x4c7   : > { %v1023_v33 = vor.u32 1.1754944e-38, %v1022_v24  ;;  %vm1021_vm2 = vcmp.eq.f32.partialorder %v1020_v22, 8.507059e+37 }
 0x4c9   : > { %v691_v17 = vpop.xlane.xlu1 %690 }
 0x4ca   : > { %v692_v18 = vadd.f32 %v691_v17, %v688_v16  ;;  %v1874_v16 = vld [vmem:[%s2769_s7 + $0xe8] sm:$0xff]  ;;  %v1873_v17 = vld [vmem:[%s2769_s7 + $0xe0] sm:$0xff] }
 0x4cb   : > { %v1970_v19 = vpop.eup %1969 }
 0x4cc   : > { %v1012_v15 = vmul.f32 %v1970_v19, %v964_v13  ;;  %1971 = vrcp.f32 %v692_v18  ;;  %vm1017_vm14 = vweird.f32 %v1970_v19  ;;  %v750_v37 = vand.u32 2147483648, %v692_v18  ;;  %v1875_v13 = vld [vmem:[%s2769_s7 + $0xf0] sm:$0xff] }
 0x4cd   : > { %vm1018_vm1 = vmor %vm1016_vm15, %vm1017_vm14  ;;  %v748_v40 = vand.u32 2147483647, %v692_v18  ;;  %vm744_vm4 = vweird.f32 %v692_v18 }
 0x4ce   : > { %v1013_v21 = vsub.f32 1.0, %v1012_v15  ;;  %v751_v43 = vor.u32 1.1754944e-38, %v750_v37  ;;  %v1870_v15 = vld [vmem:[%s2769_s7 + $0xc8] sm:$0xff]  ;;  %v1842_v37 = vld [vmem:[%s2771_s9 + $0x40] sm:$0xff] }
 0x4cf   : > { %vm749_vm6 = vcmp.eq.f32.partialorder %v748_v40, 8.507059e+37 }
 0x4d0   : > { %v1008_v26 = vpop.f32.mrf.mxu3  ;;  %v1014_v27 = vmul.f32 %v1970_v19, %v1013_v21  ;;  %v1869_v21 = vld [vmem:[%s2769_s7 + $0xc0] sm:$0xff] }
 0x4d1   : > { %v985_v28 = vpop.f32.mrf.mxu2 }
 0x4d2   : > { %v1972_v29 = vpop.eup %1971  ;;  %v1015_v30 = vadd.f32 %v1970_v19, %v1014_v27  ;;  %v1009_v23 = vadd.f32 %v1008_v26, %v985_v28 }
 0x4d3   : > { %v740_v32 = vmul.f32 %v1972_v29, %v692_v18  ;;  %vm745_vm3 = vweird.f32 %v1972_v29  ;;  %v1872_v18 = vld [vmem:[%s2769_s7 + $0xd8] sm:$0xff] }
 0x4d4   : > { %v1019_v34 = vsel %vm1018_vm1, %v1970_v19, %v1015_v30  ;;  %vm746_vm5 = vmor %vm744_vm4, %vm745_vm3  ;;  %v1871_v19 = vld [vmem:[%s2769_s7 + $0xd0] sm:$0xff] }
 0x4d5   : > { %v741_v35 = vsub.f32 1.0, %v740_v32  ;;  %v1024_v36 = vsel %vm1021_vm2, %v1023_v33, %v1019_v34 }
 0x4d6   : > { %v1025_v38 = vmul.f32 %v1024_v36, %v1009_v23  ;;  %v1844_v36 = vld [vmem:[%s2771_s9 + $0x50] sm:$0xff] }
 0x4d7   : > { %v742_v39 = vmul.f32 %v1972_v29, %v741_v35  ;;  %v1845_v35 = vld [vmem:[%s2771_s9 + $0x58] sm:$0xff] }
 0x4d8   : > { %1816 = vmatmul.msk.f32.vlgmr.msra.gmra.mxu0 %vm618_vm11, %v1025_v38  ;;  %v1142_v41 = vpop.f32.mrf.mxu3  ;;  %1359 = vmatpush.msra.mxu2 %v1845_v35 }
 0x4d9   : > { %v743_v42 = vadd.f32 %v1972_v29, %v742_v39  ;;  %v1121_v44 = vpop.f32.mrf.mxu2 }
 0x4da   : > { %v1124_v50 = vmul.f32 0.17677669, %v1121_v44  ;;  %1360 = vmatpush.msra.mxu2 %v1844_v36 }
 0x4db   : > { %v747_v45 = vsel %vm746_vm5, %v1972_v29, %v743_v42 }
 0x4dc   : > { %v752_v46 = vsel %vm749_vm6, %v751_v43, %v747_v45 }
 0x4dd   : > { %v753_v47 = vmul.f32 %v752_v46, %v2395_v20 }
 0x4df   : > { %1817 = vmatmul.msk.f32.vlgmr.msra.gmra.mxu1 %vm618_vm11, %v753_v47 }
 0x4e0   : > { %1849 = vmatmul.msk.f32.vlgmr.msrb.gmra.mxu0 %vm380_vm0, %v2286_v31  ;;  %v1145_v48 = vpop.f32.mrf.mxu3 }
 0x4e1   : > { %1853 = vmatpush.xpose.msk.msra.mxu0 %vm618_vm11, %v1145_v48  ;;  %v1208_v49 = vpop.f32.mrf.mxu2 }
 0x4e5   : > { %1854 = vmatpush.xpose.msk.msra.mxu0 %vm618_vm11, %v1142_v41 }
 0x4e7   : > { %1850 = vmatmul.msk.f32.vlgmr.msrb.gmra.mxu1 %vm380_vm0, %v2266_v14 }
 0x4e8   : > { %1855 = vmatmul.msk.f32.vlgmr.msra.gmra.mxu0 %vm618_vm11, %v1124_v50 }
 0x4e9   : > { %1301 = vmatpush.msrb.mxu0 %v1208_v49 }
 0x4eb   : > { %1429 = vmatpush.msra.mxu0 %v1876_v12 }
 0x4ed   : > { %1430 = vmatpush.msra.mxu0 %v1875_v13 }
 0x4ef   : > { %1851 = vmatmul.msk.f32.gmra.mxu1 %vm380_vm0, %v2273_v25  ;;  %1431 = vmatpush.msra.mxu0 %v1874_v16 }
 0x4f1   : > { %1432 = vmatpush.msra.mxu0 %v1873_v17 }
 0x4f3   : > { %1433 = vmatpush.msra.mxu0 %v1872_v18 }
 0x4f5   : > { %1434 = vmatpush.msra.mxu0 %v1871_v19 }
 0x4f7   : > { %1435 = vmatpush.msra.mxu0 %v1870_v15 }
 0x4f9   : > { %1436 = vmatpush.msra.mxu0 %v1869_v21 }
 0x555   : > { %v1046_v20 = vpop.f32.mrf.mxu0 }
 0x55c   : > { %v1069_v51 = vpop.f32.mrf.mxu1 }
 0x55d   : > { %v2559_v53 = vadd.f32 %v1069_v51, %v1046_v20  ;;  %v1165_v54 = vpop.f32.mrf.mxu0 }
 0x55e   : > { %1856 = vmatpush.xpose.msk.msrb.mxu3 %vm618_vm11, %v1165_v54 }
 0x561   : > { %1857 = vmatmul.msk.f32.vlgmr.msrb.gmra.mxu3 %vm618_vm11, %v1124_v50 }
 0x562   : > { %1408 = vmatpush.msra.mxu3 %v1868_v52 }
 0x564   : > { %1409 = vmatpush.msra.mxu3 %v1867_v55  ;;  %v1185_v58 = vpop.f32.mrf.mxu1 }
 0x565   : > { %v2572_v59 = vpop.f32.mrf.mxu0 }
 0x566   : > { %1410 = vmatpush.msra.mxu3 %v1866_v56  ;;  %v1263_v61 = vsel %vm671_vm12, %v2572_v59, -inf }
 0x567   : > { %1264 = vmax.xlane.f32.xlu2 %v1263_v61 }
 0x568   : > { %1411 = vmatpush.msra.mxu3 %v1865_v57 }
 0x56a   : > { %1412 = vmatpush.msra.mxu3 %v1864_v60 }
 0x56c   : > { %1413 = vmatpush.msra.mxu3 %v1863_v62  ;;  %v1188_v1 = vpop.f32.mrf.mxu1 }
 0x56d   : > { %1323 = vmatpush.msra.mxu1 %v1188_v1 }
 0x56e   : > { %1414 = vmatpush.msra.mxu3 %v1862_v63 }
 0x56f   : > { %1324 = vmatpush.msra.mxu1 %v1185_v58 }
 0x570   : > { %1415 = vmatpush.msra.mxu3 %v1861_v0 }
 0x571   : > { %1889 = vmatmul.msk.f32.vlgmr.msra.gmra.mxu3 %vm380_vm0, %v2286_v31  ;;  %1452 = vmatpush.msrb.mxu1 %v1876_v12 }
 0x572   : > { %1495 = vmatpush.msrb.mxu3 %v2591_v2 }
 0x573   : > { %1453 = vmatpush.msrb.mxu1 %v1875_v13  ;;  %v1888_v13 = vld [vmem:[%s2771_s9 + $0x78] sm:$0xff] }
 0x574   : > { %1496 = vmatpush.msrb.mxu3 %v2598_v3 }
 0x575   : > { %1454 = vmatpush.msrb.mxu1 %v1874_v16  ;;  %v1887_v16 = vld [vmem:[%s2771_s9 + $0x70] sm:$0xff] }
 0x576   : > { %1497 = vmatpush.msrb.mxu3 %v2604_v4 }
 0x577   : > { %1455 = vmatpush.msrb.mxu1 %v1873_v17  ;;  %v1886_v17 = vld [vmem:[%s2771_s9 + $0x68] sm:$0xff] }
 0x578   : > { %1498 = vmatpush.msrb.mxu3 %v2610_v5 }
 0x579   : > { %1456 = vmatpush.msrb.mxu1 %v1872_v18  ;;  %v1885_v18 = vld [vmem:[%s2771_s9 + $0x60] sm:$0xff] }
 0x57a   : > { %1499 = vmatpush.msrb.mxu3 %v2616_v6 }
 0x57b   : > { %1457 = vmatpush.msrb.mxu1 %v1871_v19 }
 0x57c   : > { %1500 = vmatpush.msrb.mxu3 %v2622_v7 }
 0x57d   : > { %1458 = vmatpush.msrb.mxu1 %v1870_v15 }
 0x57e   : > { %1501 = vmatpush.msrb.mxu3 %v2628_v8 }
 0x57f   : > { %1459 = vmatpush.msrb.mxu1 %v1869_v21 }
 0x580   : > { %1502 = vmatpush.msrb.mxu3 %v2634_v9 }
 0x581   : > { %1895 = vmatmul.msk.f32.vlgmr.msrb.gmra.mxu3 %vm380_vm0, %v2286_v31 }
 0x582   : > { %1655 = vmatpush.msra.mxu3 %v1888_v13 }
 0x584   : > { %1656 = vmatpush.msra.mxu3 %v1887_v16 }
 0x586   : > { %1657 = vmatpush.msra.mxu3 %v1886_v17 }
 0x588   : > { %1658 = vmatpush.msra.mxu3 %v1885_v18 }
 0x5da   : > { %v1265_v24 = vpop.xlane.xlu2 %1264 }
 0x5e4   : > { %v1260_v10 = vpop.f32.mrf.mxu3 }
 0x5e5   : > { %v1266_v11 = vsel %vm675_vm13, %v1260_v10, -inf }
 0x5e6   : > { %1267 = vmax.xlane.f32.xlu0 %v1266_v11 }
 0x5f4   : > { %v1417_v49 = vpop.f32.mrf.mxu3 }
 0x5f5   : > { %v1420_v54 = vmul.f32 0.17677669, %v1417_v49 }
 0x604   : > { %v1504_v60 = vpop.f32.mrf.mxu3 }
 0x659   : > { %v1268_v26 = vpop.xlane.xlu0 %1267 }
 0x65a   : > { %v1269_v27 = vmax.f32 %v1265_v24, %v1268_v26 }
 0x65c   : > { %v1270_v22 = vsub.f32 %v2572_v59, %v1269_v27  ;;  %v1273_v28 = vsub.f32 %v1260_v10, %v1269_v27 }
 0x65e   : > { %v1271_v29 = vmul.f32 1.442695, %v1270_v22  ;;  %v1274_v30 = vmul.f32 1.442695, %v1273_v28 }
 0x660   : > { %1973 = vpow2.f32 %v1271_v29 }
 0x661   : > { %1975 = vpow2.f32 %v1274_v30 }
 0x666   : > { %v1974_v32 = vpop.eup %1973 }
 0x667   : > { %v1976_v33 = vpop.eup %1975  ;;  %1859 = vmatmul.msk.f32.vlgmr.msra.gmra.mxu1 %vm671_vm12, %v1974_v32  ;;  %v1276_v23 = vsel %vm671_vm12, %v1974_v32, 0.0 }
 0x668   : > { %1858 = vmatmul.msk.f32.vlgmr.msrb.gmra.mxu0 %vm675_vm13, %v1976_v33  ;;  %v1279_v34 = vsel %vm675_vm13, %v1976_v33, 0.0  ;;  %1277 = vadd.xlane.f32.xlu1 %v1276_v23 }
 0x669   : > { %1280 = vadd.xlane.f32.xlu2 %v1279_v34 }
 0x66f   : > { %1892 = vmatmul.msk.f32.vlgmr.msrb.gmra.mxu1 %vm380_vm0, %v2286_v31  ;;  %v1843_v31 = vld [vmem:[%s2771_s9 + $0x48] sm:$0xff] }
 0x670   : > { %1890 = vmatmul.msk.f32.vlgmr.msra.gmra.mxu0 %vm380_vm0, %v2266_v14  ;;  %1361 = vmatpush.msra.mxu2 %v1843_v31 }
 0x672   : > { %1362 = vmatpush.msra.mxu2 %v1842_v37 }
 0x674   : > { %1472 = vmatpush.msrb.mxu2 %v2591_v2 }
 0x676   : > { %1473 = vmatpush.msrb.mxu2 %v2598_v3 }
 0x678   : > { %1891 = vmatmul.msk.f32.gmra.mxu0 %vm380_vm0, %v2273_v25  ;;  %1474 = vmatpush.msrb.mxu2 %v2604_v4 }
 0x67a   : > { %1475 = vmatpush.msrb.mxu2 %v2610_v5 }
 0x67c   : > { %1476 = vmatpush.msrb.mxu2 %v2616_v6 }
 0x67e   : > { %1477 = vmatpush.msrb.mxu2 %v2622_v7 }
 0x680   : > { %1478 = vmatpush.msrb.mxu2 %v2628_v8 }
 0x682   : > { %1479 = vmatpush.msrb.mxu2 %v2634_v9 }
 0x6db   : > { %v1278_v38 = vpop.xlane.xlu1 %1277 }
 0x6dc   : > { %v1281_v39 = vpop.xlane.xlu2 %1280 }
 0x6dd   : > { %v1282_v40 = vadd.f32 %v1281_v39, %v1278_v38 }
 0x6df   : > { %1977 = vrcp.f32 %v1282_v40  ;;  %v1340_v46 = vand.u32 2147483648, %v1282_v40  ;;  %v1338_v48 = vand.u32 2147483647, %v1282_v40  ;;  %vm1334_vm8 = vweird.f32 %v1282_v40 }
 0x6e1   : > { %v1341_v51 = vor.u32 1.1754944e-38, %v1340_v46  ;;  %vm1339_vm10 = vcmp.eq.f32.partialorder %v1338_v48, 8.507059e+37 }
 0x6e4   : > { %v1326_v41 = vpop.f32.mrf.mxu1 }
 0x6e5   : > { %v1978_v42 = vpop.eup %1977  ;;  %v1303_v43 = vpop.f32.mrf.mxu0 }
 0x6e6   : > { %v1330_v44 = vmul.f32 %v1978_v42, %v1282_v40  ;;  %vm1335_vm7 = vweird.f32 %v1978_v42  ;;  %v1327_v55 = vadd.f32 %v1326_v41, %v1303_v43 }
 0x6e7   : > { %vm1336_vm9 = vmor %vm1334_vm8, %vm1335_vm7 }
 0x6e8   : > { %v1331_v45 = vsub.f32 1.0, %v1330_v44 }
 0x6ea   : > { %v1332_v47 = vmul.f32 %v1978_v42, %v1331_v45 }
 0x6ec   : > { %v1333_v50 = vadd.f32 %v1978_v42, %v1332_v47  ;;  %v1461_v20 = vpop.f32.mrf.mxu1 }
 0x6ed   : > { %v1438_v52 = vpop.f32.mrf.mxu0  ;;  %1899 = vmatpush.xpose.msk.msrb.mxu0 %vm618_vm11, %v1461_v20 }
 0x6ee   : > { %v1337_v56 = vsel %vm1336_vm9, %v1978_v42, %v1333_v50 }
 0x6ef   : > { %v1342_v57 = vsel %vm1339_vm10, %v1341_v51, %v1337_v56 }
 0x6f0   : > { %v1343_v58 = vmul.f32 %v1342_v57, %v1327_v55  ;;  %1900 = vmatmul.msk.f32.vlgmr.msrb.gmra.mxu0 %vm618_vm11, %v1420_v54 }
 0x6f2   : > { %1860 = vmatmul.msk.f32.vlgmr.msra.gmra.mxu2 %vm618_vm11, %v1343_v58 }
 0x6f5   : > { %v1441_v59 = vpop.f32.mrf.mxu0 }
 0x6f6   : > { %1896 = vmatpush.xpose.msk.msra.mxu1 %vm618_vm11, %v1441_v59 }
 0x6fa   : > { %1893 = vmatmul.msk.f32.vlgmr.msrb.gmra.mxu2 %vm380_vm0, %v2266_v14  ;;  %1897 = vmatpush.xpose.msk.msra.mxu1 %vm618_vm11, %v1438_v52 }
 0x6fd   : > { %1898 = vmatmul.msk.f32.vlgmr.msra.gmra.mxu1 %vm618_vm11, %v1420_v54 }
 0x6fe   : > { %1597 = vmatpush.msrb.mxu1 %v1504_v60 }
 0x702   : > { %1894 = vmatmul.msk.f32.gmra.mxu2 %vm380_vm0, %v2273_v25 }
 0x76d   : > { %v1556_v61 = vpop.f32.mrf.mxu0 }
 0x76e   : > { %v1562_v62 = vsel %vm675_vm13, %v1556_v61, -inf }
 0x76f   : > { %1563 = vmax.xlane.f32.xlu1 %v1562_v62 }
 0x775   : > { %v1364_v63 = vpop.f32.mrf.mxu2 }
 0x776   : > { %v2708_v0 = vadd.f32 %v1364_v63, %v2559_v53 }
 0x77a   : > { %v1533_v1 = vpop.f32.mrf.mxu1 }
 0x77b   : > { %v1559_v2 = vsel %vm671_vm12, %v1533_v1, -inf }
 0x77c   : > { %1560 = vmax.xlane.f32.xlu0 %v1559_v2 }
 0x77d   : > { %v1481_v14 = vpop.f32.mrf.mxu2 }
 0x785   : > { %v1484_v3 = vpop.f32.mrf.mxu2 }
 0x786   : > { %1619 = vmatpush.msra.mxu2 %v1484_v3 }
 0x788   : > { %1620 = vmatpush.msra.mxu2 %v1481_v14 }
 0x7e2   : > { %v1564_v4 = vpop.xlane.xlu1 %1563 }
 0x7ef   : > { %v1561_v5 = vpop.xlane.xlu0 %1560 }
 0x7f0   : > { %v1565_v6 = vmax.f32 %v1561_v5, %v1564_v4 }
 0x7f2   : > { %v1566_v25 = vsub.f32 %v1533_v1, %v1565_v6  ;;  %v1569_v7 = vsub.f32 %v1556_v61, %v1565_v6 }
 0x7f4   : > { %v1567_v8 = vmul.f32 1.442695, %v1566_v25  ;;  %v1570_v9 = vmul.f32 1.442695, %v1569_v7 }
 0x7f6   : > { %1979 = vpow2.f32 %v1567_v8 }
 0x7f7   : > { %1981 = vpow2.f32 %v1570_v9 }
 0x7fc   : > { %v1980_v10 = vpop.eup %1979 }
 0x7fd   : > { %v1982_v53 = vpop.eup %1981  ;;  %1902 = vmatmul.msk.f32.vlgmr.msra.gmra.mxu2 %vm671_vm12, %v1980_v10  ;;  %v1572_v11 = vsel %vm671_vm12, %v1980_v10, 0.0 }
 0x7fe   : > { %1901 = vmatmul.msk.f32.vlgmr.msrb.gmra.mxu1 %vm675_vm13, %v1982_v53  ;;  %v1575_v12 = vsel %vm675_vm13, %v1982_v53, 0.0  ;;  %1573 = vadd.xlane.f32.xlu2 %v1572_v11 }
 0x7ff   : > { %1576 = vadd.xlane.f32.xlu0 %v1575_v12 }
 0x871   : > { %v1574_v19 = vpop.xlane.xlu2 %1573 }
 0x872   : > { %v1577_v15 = vpop.xlane.xlu0 %1576 }
 0x873   : > { %v1578_v21 = vadd.f32 %v1577_v15, %v1574_v19 }
 0x875   : > { %1983 = vrcp.f32 %v1578_v21  ;;  %v1636_v22 = vand.u32 2147483648, %v1578_v21  ;;  %v1634_v29 = vand.u32 2147483647, %v1578_v21  ;;  %vm1630_vm13 = vweird.f32 %v1578_v21 }
 0x877   : > { %v1637_v23 = vor.u32 1.1754944e-38, %v1636_v22  ;;  %vm1635_vm15 = vcmp.eq.f32.partialorder %v1634_v29, 8.507059e+37 }
 0x87b   : > { %v1984_v24 = vpop.eup %1983  ;;  %v1599_v33 = vpop.f32.mrf.mxu1 }
 0x87c   : > { %v1626_v26 = vmul.f32 %v1984_v24, %v1578_v21  ;;  %vm1631_vm12 = vweird.f32 %v1984_v24 }
 0x87d   : > { %vm1632_vm14 = vmor %vm1630_vm13, %vm1631_vm12 }
 0x87e   : > { %v1627_v27 = vsub.f32 1.0, %v1626_v26 }
 0x880   : > { %v1628_v28 = vmul.f32 %v1984_v24, %v1627_v27  ;;  %v1622_v30 = vpop.f32.mrf.mxu2 }
 0x881   : > { %v1623_v34 = vadd.f32 %v1622_v30, %v1599_v33 }
 0x882   : > { %v1629_v32 = vadd.f32 %v1984_v24, %v1628_v28 }
 0x884   : > { %v1633_v35 = vsel %vm1632_vm14, %v1984_v24, %v1629_v32 }
 0x885   : > { %v1638_v36 = vsel %vm1635_vm15, %v1637_v23, %v1633_v35 }
 0x886   : > { %v1639_v31 = vmul.f32 %v1638_v36, %v1623_v34 }
 0x888   : > { %1903 = vmatmul.msk.f32.vlgmr.msra.gmra.mxu3 %vm618_vm11, %v1639_v31 }
 0x90b   : > { %v1660_v37 = vpop.f32.mrf.mxu3 }
 0x90c   : > { %v1663_v38 = vadd.f32 %v1660_v37, %v2708_v0 }
 0x90e   : > { %1664 = vst.msk [vmem:[%s365_s30] sm:$0xff] %vm380_vm0, %v1663_v38 }
 0x90f   : > { %2012 = shalt.err (!%p2009_p3)
}
 0x910   : > { %1909 = dma.vmem_to_hbm [thread:$0]  (%p2143_p5), %s1679_s11, 128, %s1681_s12, %s1666_s18  }
 0x911 PF: > { %p1915_p4 = scmp.ge.s32.totalorder %s2047_s16, 2  ;;  %s1692_s21 = sand.u32 1, %s2035_s13  }
 0x912   : > { %s1693_s29 = scalar_lea.sflag [#allocation3], %s1692_s21 }
 0x913   : > { %p1912_p7 = pnand %p1915_p4, %p2147_p6 }
 0x915   : > { %p1913_p8 = pneg %p1912_p7 }
 0x917   : > { %2030 = dma.done.wait (%p1913_p8), %s1693_s29, 128  }
 0x918   : > { %2032 = vsyncadd (%p1913_p8), %s1693_s29, 4294967168  ;;  %p20_p9 = scmp.ge.s32.totalorder %s2130_s19, 4   ;;  %s2777_s13 = smov %s2039_s14 }
 0x919   : > { %s2778_s14 = smov %s2043_s15  ;;  %s2779_s15 = smov %s2141_s22 }
 0x91a   : > { %s2780_s16 = smov %s2130_s19  ;;  %22 = sbr.rel (!%p20_p9) target bundleno = 5 (0x5), region = 110 }
 0x91f   :  { %1699 = vsyncpa [#allocation3], 1 }
 0x920   :  { %1701 = vsyncpa [#allocation3 + $0x1], 1 }

</bundles_post_ra>
